<compile_context>
chip_gen: v5e
topology: v5e:2x2
jax: 0.10.0
libtpu: 0.0.40
codegen_flags: <defaults>
</compile_context>

<pallas_src>
import numpy as np
import jax
import jax.numpy as jnp
from jax.experimental import pallas as pl
from jax.experimental.pallas import tpu as pltpu

EPS = 1e-5          # PyTorch InstanceNorm2d default eps
LANE = 128
SUBLANE = 8


def _round_up(x, m):
    return (x + m - 1) // m * m


def _pad_reflect_upsample_indices(size_in, scale, pad):
    """Source indices implementing nearest-upsample(scale) followed by ReflectionPad(pad)."""
    size_up = size_in * scale
    idx = np.arange(-pad, size_up + pad)
    idx = np.abs(idx)
    idx = np.where(idx >= size_up, 2 * (size_up - 1) - idx, idx)
    return jnp.asarray(idx // scale, dtype=jnp.int32)


def basic_conv(x, weight, bias, gamma, beta, *, kernel_size, stride=1,
               use_upsample=False, use_normalize=True, use_relu=True,
               compute_dtype=jnp.bfloat16, rows_per_tile=8):
    """x: (N, C, H, W) f32; weight: (O, C, k, k); bias/gamma/beta: (O,).  Returns NCHW."""
    N, C, H, W = x.shape
    O = weight.shape[0]
    k = kernel_size
    pad = k // 2
    up = 2 if use_upsample else 1

    # ---- nearest-upsample + reflection pad folded into one gather (wrapper glue) ----
    h_idx = _pad_reflect_upsample_indices(H, up, pad)
    w_idx = _pad_reflect_upsample_indices(W, up, pad)
    Hp, Wp = int(h_idx.shape[0]), int(w_idx.shape[0])
    Ho = (Hp - k) // stride + 1
    Wo = (Wp - k) // stride + 1

    x_nhwc = jnp.transpose(x, (0, 2, 3, 1))            # (N, H, W, C)
    xp = x_nhwc[:, h_idx][:, :, w_idx]                 # (N, Hp, Wp, C): padded (+upsampled)

    Cpad = _round_up(C, SUBLANE)                       # align contraction to a sublane group
    Opad = _round_up(O, LANE)                          # lane-dense output / full MXU rows
    xp_flat = jnp.pad(xp.reshape(N, Hp * Wp, C), ((0, 0), (0, 0), (0, Cpad - C)))

    # ---- output-row tiling (halo rows duplicated by the gather: ~(k-1)/R extra bytes) ----
    R = rows_per_tile                                  # multiple of 8; 8 for the toy shapes,
    HT = pl.cdiv(Ho, R)                                # use 32-128 rows for realistic images.
    tile_rows = R * Wp                                 # rows of y per tile (Wp-Wo junk cols/row)
    TILE_IN = _round_up((R * stride + k - 1) * Wp + k, SUBLANE)

    starts = (jnp.arange(HT) * (R * stride * Wp))[:, None]
    row_ids = jnp.clip(starts + jnp.arange(TILE_IN)[None, :], 0, Hp * Wp - 1)
    xtiles = jnp.take(xp_flat, row_ids, axis=1)        # (N, HT, TILE_IN, Cpad)

    # ---- weights: (O, C, k, k) -> (k*k, Cpad, Opad), cast for the MXU ----
    w2 = jnp.transpose(weight, (2, 3, 1, 0)).reshape(k * k, C, O)
    w2 = jnp.pad(w2, ((0, 0), (0, Cpad - C), (0, Opad - O))).astype(compute_dtype)

    # ---- static per-tile validity mask (junk columns w>=Wo, junk rows h>=Ho) ----
    col_ok = np.arange(Wp) < Wo
    rmask_np = np.zeros((HT, tile_rows, 1), np.float32)
    for t in range(HT):
        h_ok = (np.arange(R) + t * R) < Ho
        rmask_np[t, :, 0] = (h_ok[:, None] & col_ok[None, :]).reshape(-1)
    rmask = jnp.asarray(rmask_np)

    ROWS = HT * tile_rows

    # ---- VMEM budget sized from the tiles (2x double-buffering + headroom) ----
    wbytes = np.dtype(compute_dtype).itemsize
    vmem_est = (2 * TILE_IN * _round_up(Cpad, LANE) * 4       # activation tile
                + 2 * k * k * SUBLANE * Opad * wbytes         # weights (resident)
                + 2 * tile_rows * Opad * 4                    # y tile
                + 2 * tile_rows * LANE * 4                    # mask tile
                + 4 * tile_rows * Opad * 4                    # accumulator + temporaries
                + 4 * SUBLANE * Opad * 4)                     # stats accumulators
    vmem_limit = int(min(max(2 * vmem_est, 32 * 1024 * 1024), 64 * 1024 * 1024))

    # -------- pass 1: conv (fused im2col, k*k shifted dots) + InstanceNorm stats --------
    def conv_kernel(xt_ref, w_ref, m_ref, y_ref, ssum_ref, ssq_ref):
        t = pl.program_id(1)
        acc = jnp.zeros((tile_rows, Opad), jnp.float32)
        for di in range(k):
            for dj in range(k):
                base = di * Wp + dj
                if stride == 1:
                    xs = xt_ref[base:base + tile_rows, :]
                else:
                    # TODO(synk): strided slice path implemented but not exercised by the tests.
                    xs = xt_ref[pl.ds(base, tile_rows, stride=stride), :]
                acc = acc + jnp.dot(xs.astype(compute_dtype), w_ref[di * k + dj],
                                    preferred_element_type=jnp.float32)
        y_ref[...] = acc                               # unnormalized conv output (f32)

        # single-pass stats (sum, sum of squares) accumulated across row tiles
        @pl.when(t == 0)
        def _():
            ssum_ref[...] = jnp.zeros_like(ssum_ref)
            ssq_ref[...] = jnp.zeros_like(ssq_ref)

        am = acc * m_ref[...]
        ssum_ref[...] += jnp.sum(am, axis=0, keepdims=True)
        ssq_ref[...] += jnp.sum(am * acc, axis=0, keepdims=True)

    y, ssum, ssq = pl.pallas_call(
        conv_kernel,
        out_shape=(
            jax.ShapeDtypeStruct((N, ROWS, Opad), jnp.float32),
            jax.ShapeDtypeStruct((N, 1, Opad), jnp.float32),
            jax.ShapeDtypeStruct((N, 1, Opad), jnp.float32),
        ),
        grid_spec=pltpu.PrefetchScalarGridSpec(
            num_scalar_prefetch=0,
            grid=(N, HT),
            in_specs=[
                pl.BlockSpec((None, None, TILE_IN, Cpad), lambda n, t: (n, t, 0, 0)),
                pl.BlockSpec((k * k, Cpad, Opad), lambda n, t: (0, 0, 0)),
                pl.BlockSpec((None, tile_rows, 1), lambda n, t: (t, 0, 0)),
            ],
            out_specs=[
                pl.BlockSpec((None, tile_rows, Opad), lambda n, t: (n, t, 0)),
                pl.BlockSpec((None, 1, Opad), lambda n, t: (n, 0, 0)),
                pl.BlockSpec((None, 1, Opad), lambda n, t: (n, 0, 0)),
            ],
        ),
        compiler_params=pltpu.CompilerParams(
            dimension_semantics=("parallel", "arbitrary"),
            vmem_limit_bytes=vmem_limit),
    )(xtiles, w2, rmask)

    # ---- fold InstanceNorm (or plain bias) into one scale + shift per (n, channel) ----
    gpad = jnp.pad(gamma.astype(jnp.float32), (0, Opad - O))
    bpad = jnp.pad(beta.astype(jnp.float32), (0, Opad - O))
    biaspad = jnp.pad(bias.astype(jnp.float32), (0, Opad - O))
    if use_normalize:
        # conv bias is skipped: it is cancelled exactly by the mean subtraction.
        cnt = float(Ho * Wo)
        mean = ssum / cnt
        var = jnp.maximum(ssq / cnt - mean * mean, 0.0)
        sc = gpad[None, None, :] * jax.lax.rsqrt(var + EPS)
        sh = bpad[None, None, :] - mean * sc
    else:
        sc = jnp.ones((N, 1, Opad), jnp.float32)
        sh = jnp.tile(biaspad[None, None, :], (N, 1, 1))

    # -------- pass 2: y * scale + shift (+ ReLU), lane-dense (128) tiles --------
    def norm_kernel(y_ref, sc_ref, sh_ref, o_ref):
        out = y_ref[...] * sc_ref[...] + sh_ref[...]
        if use_relu:
            out = jnp.maximum(out, 0.0)
        o_ref[...] = out.astype(o_ref.dtype)

    out = pl.pallas_call(
        norm_kernel,
        out_shape=jax.ShapeDtypeStruct((N, ROWS, Opad), x.dtype),
        grid_spec=pltpu.PrefetchScalarGridSpec(
            num_scalar_prefetch=0,
            grid=(N, HT),
            in_specs=[
                pl.BlockSpec((None, tile_rows, Opad), lambda n, t: (n, t, 0)),
                pl.BlockSpec((None, 1, Opad), lambda n, t: (n, 0, 0)),
                pl.BlockSpec((None, 1, Opad), lambda n, t: (n, 0, 0)),
            ],
            out_specs=pl.BlockSpec((None, tile_rows, Opad), lambda n, t: (n, t, 0)),
        ),
        compiler_params=pltpu.CompilerParams(
            dimension_semantics=("parallel", "parallel"),
            vmem_limit_bytes=vmem_limit),
    )(y, sc, sh)

    out = out.reshape(N, HT * R, Wp, Opad)[:, :Ho, :Wo, :O]
    # TODO(synk): keep NHWC end-to-end (or transpose inside pass 2) to drop this final XLA copy.
    return jnp.transpose(out, (0, 3, 1, 2))


def reference(x, weight, bias, gamma, beta, *, kernel_size, stride=1,
              use_upsample=False, use_normalize=True, use_relu=True):
    """Pure-JAX reference matching the PyTorch forward."""
    if use_upsample:
        x = jnp.repeat(jnp.repeat(x, 2, axis=2), 2, axis=3)
    pad = kernel_size // 2
    xp = jnp.pad(x, ((0, 0), (0, 0), (pad, pad), (pad, pad)), mode="reflect")
    y = jax.lax.conv_general_dilated(
        xp, weight, window_strides=(stride, stride), padding="VALID",
        dimension_numbers=("NCHW", "OIHW", "NCHW"))
    y = y + bias[None, :, None, None]
    if use_normalize:
        mean = jnp.mean(y, axis=(2, 3), keepdims=True)
        var = jnp.mean(jnp.square(y - mean), axis=(2, 3), keepdims=True)
        y = (y - mean) * jax.lax.rsqrt(var + EPS)
        y = y * gamma[None, :, None, None] + beta[None, :, None, None]
    if use_relu:
        y = jnp.maximum(y, 0.0)
    return y


if __name__ == "__main__":
    key = jax.random.PRNGKey(0)
    k1, k2, k3, k4, k5 = jax.random.split(key, 5)

    N, C, H, W = 2, 4, 16, 16
    O, ks = 8, 3

    x = jax.random.normal(k1, (N, C, H, W), jnp.float32)
    weight = 0.1 * jax.random.normal(k2, (O, C, ks, ks), jnp.float32)
    bias = 0.1 * jax.random.normal(k3, (O,), jnp.float32)
    gamma = 1.0 + 0.1 * jax.random.normal(k4, (O,), jnp.float32)
    beta = 0.1 * jax.random.normal(k5, (O,), jnp.float32)

    # f32 MXU path: must match the reference tightly.
    y32 = basic_conv(x, weight, bias, gamma, beta, kernel_size=ks,
                     compute_dtype=jnp.float32)
    jax.block_until_ready(y32)
    ref = reference(x, weight, bias, gamma, beta, kernel_size=ks)
    np.testing.assert_allclose(np.asarray(y32), np.asarray(ref), rtol=2e-3, atol=2e-3)

    # bf16 MXU inputs with f32 accumulation / f32 post-ops: looser tolerance.
    ybf = basic_conv(x, weight, bias, gamma, beta, kernel_size=ks,
                     compute_dtype=jnp.bfloat16)
    jax.block_until_ready(ybf)
    np.testing.assert_allclose(np.asarray(ybf), np.asarray(ref), rtol=5e-2, atol=5e-2)

    # no-normalize path (bias + ReLU only).
    y_nn = basic_conv(x, weight, bias, gamma, beta, kernel_size=ks,
                      use_normalize=False, compute_dtype=jnp.float32)
    jax.block_until_ready(y_nn)
    ref_nn = reference(x, weight, bias, gamma, beta, kernel_size=ks, use_normalize=False)
    np.testing.assert_allclose(np.asarray(y_nn), np.asarray(ref_nn), rtol=2e-3, atol=2e-3)

    # folded nearest-upsample path.
    y_up = basic_conv(x, weight, bias, gamma, beta, kernel_size=ks,
                      use_upsample=True, compute_dtype=jnp.float32)
    jax.block_until_ready(y_up)
    ref_up = reference(x, weight, bias, gamma, beta, kernel_size=ks, use_upsample=True)
    np.testing.assert_allclose(np.asarray(y_up), np.asarray(ref_up), rtol=2e-3, atol=2e-3)

    print("KERNEL_OK")
</pallas_src>

<mosaic_0001>
module attributes {stable_mosaic.version = 11 : i64} {
  func.func @conv_kernel(%arg0: i32, %arg1: i32, %arg2: memref<1x1x184x8xf32, #tpu.memory_space<vmem>>, %arg3: memref<9x8x128xf32, #tpu.memory_space<vmem>>, %arg4: memref<1x144x1xf32, #tpu.memory_space<vmem>>, %arg5: memref<1x144x128xf32, #tpu.memory_space<vmem>>, %arg6: memref<1x1x128xf32, #tpu.memory_space<vmem>>, %arg7: memref<1x1x128xf32, #tpu.memory_space<vmem>>) attributes {dimension_semantics = [#tpu.dimension_semantics<parallel>, #tpu.dimension_semantics<arbitrary>], iteration_bounds = array<i64: 2, 2>, scalar_prefetch = 0 : i64, scratch_operands = 0 : i64, tpu.core_type = #tpu.core_type<tc>, window_params = [{transform_indices = @transform_0, window_bounds = array<i64: 1, 1, 184, 8>}, {pipeline_mode = #tpu.pipeline_mode<synchronous>, transform_indices = @transform_1, window_bounds = array<i64: 9, 8, 128>}, {transform_indices = @transform_2, window_bounds = array<i64: 1, 144, 1>}, {transform_indices = @transform_3, window_bounds = array<i64: 1, 144, 128>}, {transform_indices = @transform_4, window_bounds = array<i64: 1, 1, 128>}, {transform_indices = @transform_5, window_bounds = array<i64: 1, 1, 128>}]} {
    %cst = arith.constant 0.000000e+00 : f32
    %0 = vector.broadcast %cst : f32 to vector<144x128xf32>
    %c0 = arith.constant 0 : index
    %c0_0 = arith.constant 0 : index
    %c0_1 = arith.constant 0 : index
    %c0_2 = arith.constant 0 : index
    %1 = vector.load %arg2[%c0, %c0_0, %c0_1, %c0_2] : memref<1x1x184x8xf32, #tpu.memory_space<vmem>>, vector<1x1x144x8xf32>
    %2 = vector.shape_cast %1 : vector<1x1x144x8xf32> to vector<144x8xf32>
    %c0_3 = arith.constant 0 : index
    %c0_4 = arith.constant 0 : index
    %c0_5 = arith.constant 0 : index
    %3 = vector.load %arg3[%c0_3, %c0_4, %c0_5] : memref<9x8x128xf32, #tpu.memory_space<vmem>>, vector<1x8x128xf32>
    %4 = vector.shape_cast %3 : vector<1x8x128xf32> to vector<8x128xf32>
    %cst_6 = arith.constant dense<0.000000e+00> : vector<144x128xf32>
    %5 = tpu.matmul %2, %4, %cst_6 {dimension_numbers = #tpu.dot_dimension_numbers<[1], [0], [0], [1], [0, 0, 1, 1], [], []>} : vector<144x8xf32>, vector<8x128xf32>, vector<144x128xf32> -> vector<144x128xf32>
    %6 = arith.addf %0, %5 : vector<144x128xf32>
    %c0_7 = arith.constant 0 : index
    %c0_8 = arith.constant 0 : index
    %c1 = arith.constant 1 : index
    %c0_9 = arith.constant 0 : index
    %7 = vector.load %arg2[%c0_7, %c0_8, %c1, %c0_9] : memref<1x1x184x8xf32, #tpu.memory_space<vmem>>, vector<1x1x144x8xf32>
    %8 = vector.shape_cast %7 : vector<1x1x144x8xf32> to vector<144x8xf32>
    %c1_10 = arith.constant 1 : index
    %c0_11 = arith.constant 0 : index
    %c0_12 = arith.constant 0 : index
    %9 = vector.load %arg3[%c1_10, %c0_11, %c0_12] : memref<9x8x128xf32, #tpu.memory_space<vmem>>, vector<1x8x128xf32>
    %10 = vector.shape_cast %9 : vector<1x8x128xf32> to vector<8x128xf32>
    %cst_13 = arith.constant dense<0.000000e+00> : vector<144x128xf32>
    %11 = tpu.matmul %8, %10, %cst_13 {dimension_numbers = #tpu.dot_dimension_numbers<[1], [0], [0], [1], [0, 0, 1, 1], [], []>} : vector<144x8xf32>, vector<8x128xf32>, vector<144x128xf32> -> vector<144x128xf32>
    %12 = arith.addf %6, %11 : vector<144x128xf32>
    %c0_14 = arith.constant 0 : index
    %c0_15 = arith.constant 0 : index
    %c2 = arith.constant 2 : index
    %c0_16 = arith.constant 0 : index
    %13 = vector.load %arg2[%c0_14, %c0_15, %c2, %c0_16] : memref<1x1x184x8xf32, #tpu.memory_space<vmem>>, vector<1x1x144x8xf32>
    %14 = vector.shape_cast %13 : vector<1x1x144x8xf32> to vector<144x8xf32>
    %c2_17 = arith.constant 2 : index
    %c0_18 = arith.constant 0 : index
    %c0_19 = arith.constant 0 : index
    %15 = vector.load %arg3[%c2_17, %c0_18, %c0_19] : memref<9x8x128xf32, #tpu.memory_space<vmem>>, vector<1x8x128xf32>
    %16 = vector.shape_cast %15 : vector<1x8x128xf32> to vector<8x128xf32>
    %cst_20 = arith.constant dense<0.000000e+00> : vector<144x128xf32>
    %17 = tpu.matmul %14, %16, %cst_20 {dimension_numbers = #tpu.dot_dimension_numbers<[1], [0], [0], [1], [0, 0, 1, 1], [], []>} : vector<144x8xf32>, vector<8x128xf32>, vector<144x128xf32> -> vector<144x128xf32>
    %18 = arith.addf %12, %17 : vector<144x128xf32>
    %c0_21 = arith.constant 0 : index
    %c0_22 = arith.constant 0 : index
    %c18 = arith.constant 18 : index
    %c0_23 = arith.constant 0 : index
    %19 = vector.load %arg2[%c0_21, %c0_22, %c18, %c0_23] : memref<1x1x184x8xf32, #tpu.memory_space<vmem>>, vector<1x1x144x8xf32>
    %20 = vector.shape_cast %19 : vector<1x1x144x8xf32> to vector<144x8xf32>
    %c3 = arith.constant 3 : index
    %c0_24 = arith.constant 0 : index
    %c0_25 = arith.constant 0 : index
    %21 = vector.load %arg3[%c3, %c0_24, %c0_25] : memref<9x8x128xf32, #tpu.memory_space<vmem>>, vector<1x8x128xf32>
    %22 = vector.shape_cast %21 : vector<1x8x128xf32> to vector<8x128xf32>
    %cst_26 = arith.constant dense<0.000000e+00> : vector<144x128xf32>
    %23 = tpu.matmul %20, %22, %cst_26 {dimension_numbers = #tpu.dot_dimension_numbers<[1], [0], [0], [1], [0, 0, 1, 1], [], []>} : vector<144x8xf32>, vector<8x128xf32>, vector<144x128xf32> -> vector<144x128xf32>
    %24 = arith.addf %18, %23 : vector<144x128xf32>
    %c0_27 = arith.constant 0 : index
    %c0_28 = arith.constant 0 : index
    %c19 = arith.constant 19 : index
    %c0_29 = arith.constant 0 : index
    %25 = vector.load %arg2[%c0_27, %c0_28, %c19, %c0_29] : memref<1x1x184x8xf32, #tpu.memory_space<vmem>>, vector<1x1x144x8xf32>
    %26 = vector.shape_cast %25 : vector<1x1x144x8xf32> to vector<144x8xf32>
    %c4 = arith.constant 4 : index
    %c0_30 = arith.constant 0 : index
    %c0_31 = arith.constant 0 : index
    %27 = vector.load %arg3[%c4, %c0_30, %c0_31] : memref<9x8x128xf32, #tpu.memory_space<vmem>>, vector<1x8x128xf32>
    %28 = vector.shape_cast %27 : vector<1x8x128xf32> to vector<8x128xf32>
    %cst_32 = arith.constant dense<0.000000e+00> : vector<144x128xf32>
    %29 = tpu.matmul %26, %28, %cst_32 {dimension_numbers = #tpu.dot_dimension_numbers<[1], [0], [0], [1], [0, 0, 1, 1], [], []>} : vector<144x8xf32>, vector<8x128xf32>, vector<144x128xf32> -> vector<144x128xf32>
    %30 = arith.addf %24, %29 : vector<144x128xf32>
    %c0_33 = arith.constant 0 : index
    %c0_34 = arith.constant 0 : index
    %c20 = arith.constant 20 : index
    %c0_35 = arith.constant 0 : index
    %31 = vector.load %arg2[%c0_33, %c0_34, %c20, %c0_35] : memref<1x1x184x8xf32, #tpu.memory_space<vmem>>, vector<1x1x144x8xf32>
    %32 = vector.shape_cast %31 : vector<1x1x144x8xf32> to vector<144x8xf32>
    %c5 = arith.constant 5 : index
    %c0_36 = arith.constant 0 : index
    %c0_37 = arith.constant 0 : index
    %33 = vector.load %arg3[%c5, %c0_36, %c0_37] : memref<9x8x128xf32, #tpu.memory_space<vmem>>, vector<1x8x128xf32>
    %34 = vector.shape_cast %33 : vector<1x8x128xf32> to vector<8x128xf32>
    %cst_38 = arith.constant dense<0.000000e+00> : vector<144x128xf32>
    %35 = tpu.matmul %32, %34, %cst_38 {dimension_numbers = #tpu.dot_dimension_numbers<[1], [0], [0], [1], [0, 0, 1, 1], [], []>} : vector<144x8xf32>, vector<8x128xf32>, vector<144x128xf32> -> vector<144x128xf32>
    %36 = arith.addf %30, %35 : vector<144x128xf32>
    %c0_39 = arith.constant 0 : index
    %c0_40 = arith.constant 0 : index
    %c36 = arith.constant 36 : index
    %c0_41 = arith.constant 0 : index
    %37 = vector.load %arg2[%c0_39, %c0_40, %c36, %c0_41] : memref<1x1x184x8xf32, #tpu.memory_space<vmem>>, vector<1x1x144x8xf32>
    %38 = vector.shape_cast %37 : vector<1x1x144x8xf32> to vector<144x8xf32>
    %c6 = arith.constant 6 : index
    %c0_42 = arith.constant 0 : index
    %c0_43 = arith.constant 0 : index
    %39 = vector.load %arg3[%c6, %c0_42, %c0_43] : memref<9x8x128xf32, #tpu.memory_space<vmem>>, vector<1x8x128xf32>
    %40 = vector.shape_cast %39 : vector<1x8x128xf32> to vector<8x128xf32>
    %cst_44 = arith.constant dense<0.000000e+00> : vector<144x128xf32>
    %41 = tpu.matmul %38, %40, %cst_44 {dimension_numbers = #tpu.dot_dimension_numbers<[1], [0], [0], [1], [0, 0, 1, 1], [], []>} : vector<144x8xf32>, vector<8x128xf32>, vector<144x128xf32> -> vector<144x128xf32>
    %42 = arith.addf %36, %41 : vector<144x128xf32>
    %c0_45 = arith.constant 0 : index
    %c0_46 = arith.constant 0 : index
    %c37 = arith.constant 37 : index
    %c0_47 = arith.constant 0 : index
    %43 = vector.load %arg2[%c0_45, %c0_46, %c37, %c0_47] : memref<1x1x184x8xf32, #tpu.memory_space<vmem>>, vector<1x1x144x8xf32>
    %44 = vector.shape_cast %43 : vector<1x1x144x8xf32> to vector<144x8xf32>
    %c7 = arith.constant 7 : index
    %c0_48 = arith.constant 0 : index
    %c0_49 = arith.constant 0 : index
    %45 = vector.load %arg3[%c7, %c0_48, %c0_49] : memref<9x8x128xf32, #tpu.memory_space<vmem>>, vector<1x8x128xf32>
    %46 = vector.shape_cast %45 : vector<1x8x128xf32> to vector<8x128xf32>
    %cst_50 = arith.constant dense<0.000000e+00> : vector<144x128xf32>
    %47 = tpu.matmul %44, %46, %cst_50 {dimension_numbers = #tpu.dot_dimension_numbers<[1], [0], [0], [1], [0, 0, 1, 1], [], []>} : vector<144x8xf32>, vector<8x128xf32>, vector<144x128xf32> -> vector<144x128xf32>
    %48 = arith.addf %42, %47 : vector<144x128xf32>
    %c0_51 = arith.constant 0 : index
    %c0_52 = arith.constant 0 : index
    %c38 = arith.constant 38 : index
    %c0_53 = arith.constant 0 : index
    %49 = vector.load %arg2[%c0_51, %c0_52, %c38, %c0_53] : memref<1x1x184x8xf32, #tpu.memory_space<vmem>>, vector<1x1x144x8xf32>
    %50 = vector.shape_cast %49 : vector<1x1x144x8xf32> to vector<144x8xf32>
    %c8 = arith.constant 8 : index
    %c0_54 = arith.constant 0 : index
    %c0_55 = arith.constant 0 : index
    %51 = vector.load %arg3[%c8, %c0_54, %c0_55] : memref<9x8x128xf32, #tpu.memory_space<vmem>>, vector<1x8x128xf32>
    %52 = vector.shape_cast %51 : vector<1x8x128xf32> to vector<8x128xf32>
    %cst_56 = arith.constant dense<0.000000e+00> : vector<144x128xf32>
    %53 = tpu.matmul %50, %52, %cst_56 {dimension_numbers = #tpu.dot_dimension_numbers<[1], [0], [0], [1], [0, 0, 1, 1], [], []>} : vector<144x8xf32>, vector<8x128xf32>, vector<144x128xf32> -> vector<144x128xf32>
    %54 = arith.addf %48, %53 : vector<144x128xf32>
    %c0_57 = arith.constant 0 : index
    %c0_58 = arith.constant 0 : index
    %c0_59 = arith.constant 0 : index
    %55 = vector.load %arg5[%c0_57, %c0_58, %c0_59] : memref<1x144x128xf32, #tpu.memory_space<vmem>>, vector<1x144x128xf32>
    %56 = vector.shape_cast %55 : vector<1x144x128xf32> to vector<144x128xf32>
    %57 = vector.shape_cast %54 : vector<144x128xf32> to vector<1x144x128xf32>
    tpu.vector_store %arg5[%c0_57, %c0_58, %c0_59], %57 {strides = array<i32>} : memref<1x144x128xf32, #tpu.memory_space<vmem>>, vector<1x144x128xf32>,
    %c0_i32 = arith.constant 0 : i32
    %58 = arith.cmpi eq, %arg1, %c0_i32 : i32
    %59 = arith.extui %58 : i1 to i32
    %c0_i32_60 = arith.constant 0 : i32
    %60 = arith.cmpi ne, %59, %c0_i32_60 : i32
    scf.if %60 {
      %cst_78 = arith.constant 0.000000e+00 : f32
      %82 = vector.broadcast %cst_78 : f32 to vector<1x128xf32>
      %c0_79 = arith.constant 0 : index
      %c0_80 = arith.constant 0 : index
      %c0_81 = arith.constant 0 : index
      %83 = vector.load %arg6[%c0_79, %c0_80, %c0_81] : memref<1x1x128xf32, #tpu.memory_space<vmem>>, vector<1x1x128xf32>
      %84 = vector.shape_cast %83 : vector<1x1x128xf32> to vector<1x128xf32>
      %85 = vector.shape_cast %82 : vector<1x128xf32> to vector<1x1x128xf32>
      tpu.vector_store %arg6[%c0_79, %c0_80, %c0_81], %85 {strides = array<i32>} : memref<1x1x128xf32, #tpu.memory_space<vmem>>, vector<1x1x128xf32>,
      %cst_82 = arith.constant 0.000000e+00 : f32
      %86 = vector.broadcast %cst_82 : f32 to vector<1x128xf32>
      %c0_83 = arith.constant 0 : index
      %c0_84 = arith.constant 0 : index
      %c0_85 = arith.constant 0 : index
      %87 = vector.load %arg7[%c0_83, %c0_84, %c0_85] : memref<1x1x128xf32, #tpu.memory_space<vmem>>, vector<1x1x128xf32>
      %88 = vector.shape_cast %87 : vector<1x1x128xf32> to vector<1x128xf32>
      %89 = vector.shape_cast %86 : vector<1x128xf32> to vector<1x1x128xf32>
      tpu.vector_store %arg7[%c0_83, %c0_84, %c0_85], %89 {strides = array<i32>} : memref<1x1x128xf32, #tpu.memory_space<vmem>>, vector<1x1x128xf32>,
    } else {
    }
    %c0_61 = arith.constant 0 : index
    %c0_62 = arith.constant 0 : index
    %c0_63 = arith.constant 0 : index
    %61 = vector.load %arg4[%c0_61, %c0_62, %c0_63] : memref<1x144x1xf32, #tpu.memory_space<vmem>>, vector<1x144x1xf32>
    %62 = vector.shape_cast %61 : vector<1x144x1xf32> to vector<144x1xf32>
    %63 = vector.broadcast %62 : vector<144x1xf32> to vector<144x128xf32>
    %64 = arith.mulf %54, %63 : vector<144x128xf32>
    %c0_64 = arith.constant 0 : index
    %c0_65 = arith.constant 0 : index
    %c0_66 = arith.constant 0 : index
    %65 = vector.load %arg6[%c0_64, %c0_65, %c0_66] : memref<1x1x128xf32, #tpu.memory_space<vmem>>, vector<1x1x128xf32>
    %66 = vector.shape_cast %65 : vector<1x1x128xf32> to vector<1x128xf32>
    %cst_67 = arith.constant dense<0.000000e+00> : vector<128xf32>
    %67 = vector.multi_reduction <add>, %64, %cst_67 [0] : vector<144x128xf32> to vector<128xf32>
    %68 = vector.shape_cast %67 : vector<128xf32> to vector<1x128xf32>
    %69 = arith.addf %66, %68 : vector<1x128xf32>
    %c0_68 = arith.constant 0 : index
    %c0_69 = arith.constant 0 : index
    %c0_70 = arith.constant 0 : index
    %70 = vector.load %arg6[%c0_68, %c0_69, %c0_70] : memref<1x1x128xf32, #tpu.memory_space<vmem>>, vector<1x1x128xf32>
    %71 = vector.shape_cast %70 : vector<1x1x128xf32> to vector<1x128xf32>
    %72 = vector.shape_cast %69 : vector<1x128xf32> to vector<1x1x128xf32>
    tpu.vector_store %arg6[%c0_68, %c0_69, %c0_70], %72 {strides = array<i32>} : memref<1x1x128xf32, #tpu.memory_space<vmem>>, vector<1x1x128xf32>,
    %c0_71 = arith.constant 0 : index
    %c0_72 = arith.constant 0 : index
    %c0_73 = arith.constant 0 : index
    %73 = vector.load %arg7[%c0_71, %c0_72, %c0_73] : memref<1x1x128xf32, #tpu.memory_space<vmem>>, vector<1x1x128xf32>
    %74 = vector.shape_cast %73 : vector<1x1x128xf32> to vector<1x128xf32>
    %75 = arith.mulf %64, %54 : vector<144x128xf32>
    %cst_74 = arith.constant dense<0.000000e+00> : vector<128xf32>
    %76 = vector.multi_reduction <add>, %75, %cst_74 [0] : vector<144x128xf32> to vector<128xf32>
    %77 = vector.shape_cast %76 : vector<128xf32> to vector<1x128xf32>
    %78 = arith.addf %74, %77 : vector<1x128xf32>
    %c0_75 = arith.constant 0 : index
    %c0_76 = arith.constant 0 : index
    %c0_77 = arith.constant 0 : index
    %79 = vector.load %arg7[%c0_75, %c0_76, %c0_77] : memref<1x1x128xf32, #tpu.memory_space<vmem>>, vector<1x1x128xf32>
    %80 = vector.shape_cast %79 : vector<1x1x128xf32> to vector<1x128xf32>
    %81 = vector.shape_cast %78 : vector<1x128xf32> to vector<1x1x128xf32>
    tpu.vector_store %arg7[%c0_75, %c0_76, %c0_77], %81 {strides = array<i32>} : memref<1x1x128xf32, #tpu.memory_space<vmem>>, vector<1x1x128xf32>,
    return
  }
  func.func @transform_0(%arg0: i32, %arg1: i32) -> (i32, i32, i32, i32) {
    %c0_i32 = arith.constant 0 : i32
    %c0_i32_0 = arith.constant 0 : i32
    %c0_i32_1 = arith.constant 0 : i32
    return %arg0, %arg1, %c0_i32, %c0_i32_0 : i32, i32, i32, i32
  }
  func.func @transform_1(%arg0: i32, %arg1: i32) -> (i32, i32, i32) {
    %c0_i32 = arith.constant 0 : i32
    %c0_i32_0 = arith.constant 0 : i32
    %c0_i32_1 = arith.constant 0 : i32
    %c0_i32_2 = arith.constant 0 : i32
    return %c0_i32, %c0_i32_0, %c0_i32_1 : i32, i32, i32
  }
  func.func @transform_2(%arg0: i32, %arg1: i32) -> (i32, i32, i32) {
    %c0_i32 = arith.constant 0 : i32
    %c0_i32_0 = arith.constant 0 : i32
    %c0_i32_1 = arith.constant 0 : i32
    return %arg1, %c0_i32, %c0_i32_0 : i32, i32, i32
  }
  func.func @transform_3(%arg0: i32, %arg1: i32) -> (i32, i32, i32) {
    %c0_i32 = arith.constant 0 : i32
    %c0_i32_0 = arith.constant 0 : i32
    return %arg0, %arg1, %c0_i32 : i32, i32, i32
  }
  func.func @transform_4(%arg0: i32, %arg1: i32) -> (i32, i32, i32) {
    %c0_i32 = arith.constant 0 : i32
    %c0_i32_0 = arith.constant 0 : i32
    %c0_i32_1 = arith.constant 0 : i32
    return %arg0, %c0_i32, %c0_i32_0 : i32, i32, i32
  }
  func.func @transform_5(%arg0: i32, %arg1: i32) -> (i32, i32, i32) {
    %c0_i32 = arith.constant 0 : i32
    %c0_i32_0 = arith.constant 0 : i32
    %c0_i32_1 = arith.constant 0 : i32
    return %arg0, %c0_i32, %c0_i32_0 : i32, i32, i32
  }
}

</mosaic_0001>

<bundles_post_ra>
// kernel: tpu_custom_call.1
= control target key start
LH: loop header
LB: loop body
LE: loop exit
PB: predicated region body
PF: predicated region fallthrough
CT: control target
= control target key end

     0   :  { %s3470_s0 = inlined_call_operand.vmem [shape: f32[2,2,184,8], index: 0, kind: input, shape index: {}]   ;;  %s3471_s1 = inlined_call_operand.vmem [shape: f32[9,8,128], index: 1, kind: input, shape index: {}]   ;;  %s3472_s2 = inlined_call_operand.vmem [shape: f32[2,144,1], index: 2, kind: input, shape index: {}]   ;;  %s3473_s3 = inlined_call_operand.hbm [shape: f32[2,288,128], index: 3, kind: output, shape index: {0}]   ;;  %s3474_s4 = inlined_call_operand.hbm [shape: f32[2,1,128], index: 4, kind: output, shape index: {1}]   ;;  %s3475_s5 = inlined_call_operand.hbm [shape: f32[2,1,128], index: 5, kind: output, shape index: {2}]  }
   0x1   :  { %3484 = sst [smem:[#allocation15_spill]] %s3470_s0 }
   0x2   :  { %3485 = sst [smem:[#allocation16_spill]] %s3471_s1 }
   0x3   :  { %3486 = sst [smem:[#allocation17_spill]] %s3472_s2 }
   0x4   :  { %11 = vsyncpa [#allocation3], 0 }
   0x5   :  { %13 = vsyncpa [#allocation3 + $0x1], 0 }
   0x6   :  { %14 = vsyncpa [#allocation5], 0 }
   0x7   :  { %16 = vsyncpa [#allocation5 + $0x1], 0  ;;  %s2656_s18 = smov 0   ;;  %s2658_s19 = smov 0  }
   0x8   :  { %s2660_s20 = smov 0   ;;  %s2662_s21 = smov 0  }
   0x9   :  { %s2664_s22 = smov 0   ;;  %s2666_s23 = smov 0  }
   0xa   :  { %s2668_s24 = smov 0   ;;  %s2670_s25 = smov 0  }
   0xb   :  { %s2672_s26 = smov 0   ;;  %s2674_s27 = smov 0  }
   0xc   :  { %s2676_s28 = smov 0  }
   0xd LB: > { %3487 = sst [smem:[#allocation9_spill]] %s2600_s23  ;;  %s3477_s29 = sadd.s32 4294967295, %s2620_s28   ;;  %s2620_s28 = sphi %s2676_s28, %s22_s28   ;;  %s2616_s27 = sphi %s2674_s27, %s3512_s27   ;;  %s2612_s26 = sphi %s2672_s26, %s3511_s26   ;;  %s2608_s25 = sphi %s2670_s25, %s3510_s25   ;;  %s2604_s24 = sphi %s2668_s24, %s3509_s24   ;;  %s2600_s23 = sphi %s2666_s23, %s3508_s23   ;;  %s2596_s22 = sphi %s2664_s22, %s3517_s22   ;;  %s2592_s21 = sphi %s2662_s21, %s3516_s21   ;;  %s2588_s20 = sphi %s2660_s20, %s3515_s20   ;;  %s2584_s19 = sphi %s2658_s19, %s3514_s19   ;;  %s2580_s18 = sphi %s2656_s18, %s3513_s18  }
   0xe   : > { %3488 = sst [smem:[#allocation10_spill]] %s2612_s26  ;;  %s3476_s30 = sadd.s32 4294967294, %s2620_s28  }
   0xf   : > { %3489 = sst [smem:[#allocation11_spill]] %s2616_s27  ;;  %s31_s6 = sadd.s32 1, %s2612_s26 }
  0x10   : > { %s34_s7 = sadd.s32 1, %s2616_s27  ;;  %p32_p0 = scmp.ge.s32.totalorder %s31_s6, 2 }
  0x11   : > { %s118_s8 = sadd.s32 1, %s2600_s23  ;;  %p128_p1 = scmp.ne.s32.totalorder %s2600_s23, %s2596_s22 }
  0x12   : > { %p2720_p2 = scmp.eq.s32.totalorder %s3477_s29, 3  ;;  %s3519_s6 = smov (%p32_p0, %s31_s6), 0 }
  0x13   : > { %3491 = sst [smem:[#allocation12_spill]] %s3519_s6  ;;  %s3521_s7 = smov (!%p32_p0, %s34_s7), %s2616_s27 }
  0x14   : > { %s114_s10 = ssub.s32 %s2612_s26, %s3519_s6  ;;  %p2731_p3 = por %p2720_p2, %p128_p1 }
  0x15   : > { %p36_p4 = scmp.ge.s32.totalorder %s3521_s7, 2  ;;  %p134_p5 = scmp.ne.s32.totalorder %s2596_s22, %s2592_s21 }
  0x16   : > { %p2739_p6 = scmp.eq.s32.totalorder %s3476_s30, 3  ;;  %s144_s13 = sadd.s32 1, %s2588_s20 }
  0x17   : > { %s3523_s7 = smov (%p36_p4, %s3521_s7), 0  ;;  %p154_p8 = scmp.ne.s32.totalorder %s2588_s20, %s2584_s19 }
  0x18   : > { %3494 = sst [smem:[#allocation13_spill]] %s3523_s7  ;;  %p2748_p7 = por %p2739_p6, %p134_p5 }
  0x19   : > { %s113_s15 = ssub.s32 %s2616_s27, %s3523_s7  ;;  %p160_p9 = scmp.ne.s32.totalorder %s2584_s19, %s2580_s18 }
  0x1a   : > { %s115_s16 = sor.u32 %s114_s10, %s113_s15  ;;  %p142_p10 = scmp.eq.s32.totalorder %s113_s15, 0 }
  0x1b   : > { %p116_p11 = scmp.eq.s32.totalorder %s115_s16, 0  ;;  %p2760_p12 = por %p154_p8, %p2720_p2 }
  0x1c   : > { %s2765_s30 = scalar_select %p142_p10, %s2588_s20, %s144_s13  }
  0x1d   : > { %s2768_s29 = scalar_select %p116_p11, %s2600_s23, %s118_s8  }
  0x1e   : > { %p2772_p13 = por %p160_p9, %p2739_p6  ;;  %p2145_p0 = scmp.ge.s32.totalorder %s2620_s28, 1 }
  0x1f   : > { %3497 = sst [smem:[#allocation14_spill]] %s2768_s29  ;;  %p228_p1 = scmp.lt.s32.totalorder %s2620_s28, 5 }
  0x21   : > { %p229_p4 = pnand %p2145_p0, %p228_p1 }
  0x22   : > { %s3499_s1 = sld [smem:[#allocation16_spill]] (!%p229_p4)  ;;  %p273_p2 = scmp.lt.s32.totalorder (!%p229_p4), %s2608_s25, 1 }
  0x23   : > { %232 = sbr.rel (%p229_p4) target bundleno = 706 (0x2c2), region = 32  ;;  %p275_p5 = scmp.lt.s32.totalorder (!%p229_p4), %s2604_s24, 1 }
  0x24   : > { %s3500_s2 = sld [smem:[#allocation17_spill]] (!%p229_p4)  ;;  %s3483_s16 = sand.u32 (!%p229_p4), 1, %s2596_s22  }
  0x25   : > { %s3501_s0 = sld [smem:[#allocation15_spill]] (!%p229_p4)  ;;  %s2325_s7 = smul.u32 (!%p229_p4), 144, %s3483_s16 }
  0x26   : > { %p2318_p6 = scmp.ne.s32.totalorder (!%p229_p4), %s2604_s24, 0 }
  0x27   : > { %s3206_s10 = scalar_lea.vmem (!%p229_p4), [#allocation2], %s2325_s7 }
  0x28   : > { %v2148_v0 = vld [vmem:[%s3499_s1 + $0x8] sm:$0xff]  ;;  %v2185_v1 = vld [vmem:[%s3499_s1 + $0x10] sm:$0xff]  ;;  %v306_v2 = vld [vmem:[%s3499_s1] sm:$0xff]  ;;  %s274_s27 = scalar_select %p273_p2, %s2608_s25, 1  ;;  %vm327_vm0 = vcmask 64512  }
  0x29   : > { %2322 = vmatpush.msra.mxu1 %v2148_v0  ;;  %2323 = vmatpush.msra.mxu2 %v2148_v0  ;;  %v2223_v3 = vld [vmem:[%s3499_s1 + $0x20] sm:$0xff]  ;;  %v2204_v4 = vld [vmem:[%s3499_s1 + $0x18] sm:$0xff]  ;;  %s276_s8 = scalar_select %p275_p5, %s2604_s24, 1  ;;  %v2261_v13 = vld [vmem:[%s3499_s1 + $0x30] sm:$0xff] }
  0x2a   : > { %397 = vmatpush.msra.mxu0 %v2148_v0  ;;  %2324 = vmatpush.msra.mxu3 %v2148_v0  ;;  %s2327_s9 = smul.u32 46, %s274_s27  ;;  %v2280_v14 = vld [vmem:[%s3499_s1 + $0x38] sm:$0xff]  ;;  %v2242_v15 = vld [vmem:[%s3499_s1 + $0x28] sm:$0xff]  ;;  %v2299_v20 = vld [vmem:[%s3499_s1 + $0x40] sm:$0xff] }
  0x2b   : > { %667 = vmatpush.msrb.mxu2 %v2185_v1  ;;  %522 = vmatpush.msrb.mxu1 %v306_v2  ;;  %s2326_s12 = smul.u32 23, %s276_s8 }
  0x2c   : > { %993 = vmatpush.msrb.mxu0 %v2223_v3  ;;  %830 = vmatpush.msrb.mxu3 %v2204_v4  ;;  %s2328_s13 = smul.u32 144, %s276_s8 }
  0x2d   : > { %s279_s15 = sadd.s32 %s2327_s9, %s2326_s12 }
  0x2e   : > { %s2146_s26 = sshll.u32 %s279_s15, 3  ;;  %s2801_s18 = scalar_lea.vmem %s3500_s2, %s2328_s13 }
  0x2f   : > { %s2806_s23 = scalar_lea.vmem %s3501_s0, %s2146_s26 }
  0x30   : > { %v312_v5 = vld [vmem:[%s2806_s23 + $0x29] sm:$0xff]  ;;  %v317_v6 = vld [vmem:[%s2806_s23 + $0x51] sm:$0xff]  ;;  %v307_v7 = vld [vmem:[%s2806_s23 + $0x1] sm:$0xff] }
  0x31   : > { %2154 = vmatmul.msk.f32.vlgmr.msra.gmra.mxu1 %vm327_vm0, %v312_v5  ;;  %2159 = vmatmul.msk.f32.vlgmr.msra.gmra.mxu2 %vm327_vm0, %v317_v6  ;;  %v322_v8 = vld [vmem:[%s2806_s23 + $0x79] sm:$0xff]  ;;  %v313_v9 = vld [vmem:[%s2806_s23 + $0x31] sm:$0xff]  ;;  %v308_v11 = vld [vmem:[%s2806_s23 + $0x9] sm:$0xff] }
  0x32   : > { %2149 = vmatmul.msk.f32.vlgmr.msra.gmra.mxu0 %vm327_vm0, %v307_v7  ;;  %2164 = vmatmul.msk.f32.vlgmr.msra.gmra.mxu3 %vm327_vm0, %v322_v8  ;;  %v318_v10 = vld [vmem:[%s2806_s23 + $0x59] sm:$0xff]  ;;  %v323_v12 = vld [vmem:[%s2806_s23 + $0x81] sm:$0xff]  ;;  %v309_v18 = vld [vmem:[%s2806_s23 + $0x11] sm:$0xff] }
  0x33   : > { %1319 = vmatpush.msra.mxu2 %v2261_v13  ;;  %1156 = vmatpush.msra.mxu1 %v2242_v15  ;;  %v314_v16 = vld [vmem:[%s2806_s23 + $0x39] sm:$0xff]  ;;  %v319_v17 = vld [vmem:[%s2806_s23 + $0x61] sm:$0xff]  ;;  %v324_v19 = vld [vmem:[%s2806_s23 + $0x89] sm:$0xff] }
  0x34   : > { %1482 = vmatpush.msra.mxu3 %v2280_v14  ;;  %1645 = vmatpush.msra.mxu0 %v2299_v20  ;;  %v315_v21 = vld [vmem:[%s2806_s23 + $0x41] sm:$0xff]  ;;  %v320_v22 = vld [vmem:[%s2806_s23 + $0x69] sm:$0xff]  ;;  %v310_v23 = vld [vmem:[%s2806_s23 + $0x19] sm:$0xff] }
  0x35   : > { %v741_v24 = vld [vmem:[%s2806_s23 + $0x12] sm:$0xff]  ;;  %v316_v25 = vld [vmem:[%s2806_s23 + $0x49] sm:$0xff]  ;;  %v311_v27 = vld [vmem:[%s2806_s23 + $0x21] sm:$0xff] }
  0x36   : > { %v321_v26 = vld [vmem:[%s2806_s23 + $0x71] sm:$0xff]  ;;  %v742_v28 = vld [vmem:[%s2806_s23 + $0x1a] sm:$0xff]  ;;  %v578_v30 = vld [vmem:[%s2806_s23 + $0x2] sm:$0xff] }
  0x37   : > { %v288_v29 = vld [vmem:[%s2806_s23] sm:$0xff]  ;;  %v904_v31 = vld [vmem:[%s2806_s23 + $0x13] sm:$0xff]  ;;  %v289_v33 = vld [vmem:[%s2806_s23 + $0x8] sm:$0xff] }
  0x38   : > { %v743_v32 = vld [vmem:[%s2806_s23 + $0x22] sm:$0xff]  ;;  %v579_v34 = vld [vmem:[%s2806_s23 + $0xa] sm:$0xff]  ;;  %v745_v39 = vld [vmem:[%s2806_s23 + $0x32] sm:$0xff] }
  0x39   : > { %2155 = vmatmul.msk.f32.gmra.mxu1 %vm327_vm0, %v313_v9  ;;  %2160 = vmatmul.msk.f32.gmra.mxu2 %vm327_vm0, %v318_v10  ;;  %v905_v35 = vld [vmem:[%s2806_s23 + $0x1b] sm:$0xff]  ;;  %v744_v36 = vld [vmem:[%s2806_s23 + $0x2a] sm:$0xff]  ;;  %v908_v44 = vld [vmem:[%s2806_s23 + $0x33] sm:$0xff] }
  0x3a   : > { %2150 = vmatmul.msk.f32.gmra.mxu0 %vm327_vm0, %v308_v11  ;;  %2165 = vmatmul.msk.f32.gmra.mxu3 %vm327_vm0, %v323_v12  ;;  %v290_v37 = vld [vmem:[%s2806_s23 + $0x10] sm:$0xff]  ;;  %v906_v38 = vld [vmem:[%s2806_s23 + $0x23] sm:$0xff]  ;;  %v291_v40 = vld [vmem:[%s2806_s23 + $0x18] sm:$0xff] }
  0x3b   : > { %v907_v41 = vld [vmem:[%s2806_s23 + $0x2b] sm:$0xff]  ;;  %v746_v42 = vld [vmem:[%s2806_s23 + $0x3a] sm:$0xff]  ;;  %v747_v45 = vld [vmem:[%s2806_s23 + $0x42] sm:$0xff] }
  0x3c   : > { %v292_v43 = vld [vmem:[%s2806_s23 + $0x20] sm:$0xff]  ;;  %v293_v46 = vld [vmem:[%s2806_s23 + $0x28] sm:$0xff]  ;;  %v294_v49 = vld [vmem:[%s2806_s23 + $0x30] sm:$0xff] }
  0x3d   : > { %v909_v47 = vld [vmem:[%s2806_s23 + $0x3b] sm:$0xff]  ;;  %v748_v48 = vld [vmem:[%s2806_s23 + $0x4a] sm:$0xff]  ;;  %v749_v51 = vld [vmem:[%s2806_s23 + $0x52] sm:$0xff] }
  0x3e   : > { %v910_v50 = vld [vmem:[%s2806_s23 + $0x43] sm:$0xff]  ;;  %v295_v52 = vld [vmem:[%s2806_s23 + $0x38] sm:$0xff]  ;;  %v911_v53 = vld [vmem:[%s2806_s23 + $0x4b] sm:$0xff] }
  0x3f   : > { %v750_v54 = vld [vmem:[%s2806_s23 + $0x5a] sm:$0xff]  ;;  %v751_v57 = vld [vmem:[%s2806_s23 + $0x62] sm:$0xff]  ;;  %v752_v60 = vld [vmem:[%s2806_s23 + $0x6a] sm:$0xff] }
  0x40   : > { %v296_v55 = vld [vmem:[%s2806_s23 + $0x40] sm:$0xff]  ;;  %v912_v56 = vld [vmem:[%s2806_s23 + $0x53] sm:$0xff]  ;;  %v297_v58 = vld [vmem:[%s2806_s23 + $0x48] sm:$0xff] }
  0x41   : > { %2156 = vmatmul.msk.f32.gmra.mxu1 %vm327_vm0, %v314_v16  ;;  %2161 = vmatmul.msk.f32.gmra.mxu2 %vm327_vm0, %v319_v17  ;;  %v913_v59 = vld [vmem:[%s2806_s23 + $0x5b] sm:$0xff]  ;;  %v298_v61 = vld [vmem:[%s2806_s23 + $0x50] sm:$0xff]  ;;  %v914_v62 = vld [vmem:[%s2806_s23 + $0x63] sm:$0xff] }
  0x42   : > { %2151 = vmatmul.msk.f32.gmra.mxu0 %vm327_vm0, %v309_v18  ;;  %2166 = vmatmul.msk.f32.gmra.mxu3 %vm327_vm0, %v324_v19  ;;  %v753_v63 = vld [vmem:[%s2806_s23 + $0x72] sm:$0xff]  ;;  %v754_v4 = vld [vmem:[%s2806_s23 + $0x7a] sm:$0xff]  ;;  %v755_v11 = vld [vmem:[%s2806_s23 + $0x82] sm:$0xff] }
  0x43   : > { %v299_v1 = vld [vmem:[%s2806_s23 + $0x58] sm:$0xff]  ;;  %v915_v3 = vld [vmem:[%s2806_s23 + $0x6b] sm:$0xff]  ;;  %v300_v7 = vld [vmem:[%s2806_s23 + $0x60] sm:$0xff] }
  0x44   : > { %v916_v10 = vld [vmem:[%s2806_s23 + $0x73] sm:$0xff]  ;;  %v301_v14 = vld [vmem:[%s2806_s23 + $0x68] sm:$0xff]  ;;  %v917_v17 = vld [vmem:[%s2806_s23 + $0x7b] sm:$0xff] }
  0x45   : > { %v756_v18 = vld [vmem:[%s2806_s23 + $0x8a] sm:$0xff] }
  0x49   : > { %2157 = vmatmul.msk.f32.gmra.mxu1 %vm327_vm0, %v315_v21  ;;  %2162 = vmatmul.msk.f32.gmra.mxu2 %vm327_vm0, %v320_v22  ;;  %v302_v21 = vld [vmem:[%s2806_s23 + $0x70] sm:$0xff] }
  0x4a   : > { %2152 = vmatmul.msk.f32.gmra.mxu0 %vm327_vm0, %v310_v23  ;;  %2205 = vmatmul.msk.f32.vlgmr.msrb.gmra.mxu3 %vm327_vm0, %v741_v24 }
  0x51   : > { %2158 = vmatmul.msk.f32.gmra.mxu1 %vm327_vm0, %v316_v25  ;;  %2163 = vmatmul.msk.f32.gmra.mxu2 %vm327_vm0, %v321_v26  ;;  %v757_v25 = vld [vmem:[%s2806_s23 + $0x92] sm:$0xff] }
  0x52   : > { %2153 = vmatmul.msk.f32.gmra.mxu0 %vm327_vm0, %v311_v27  ;;  %2206 = vmatmul.msk.f32.gmra.mxu3 %vm327_vm0, %v742_v28 }
  0x59   : > { %2167 = vmatmul.msk.f32.vlgmr.msrb.gmra.mxu1 %vm327_vm0, %v288_v29  ;;  %2186 = vmatmul.msk.f32.vlgmr.msrb.gmra.mxu2 %vm327_vm0, %v578_v30 }
  0x5a   : > { %2224 = vmatmul.msk.f32.vlgmr.msrb.gmra.mxu0 %vm327_vm0, %v904_v31  ;;  %2207 = vmatmul.msk.f32.gmra.mxu3 %vm327_vm0, %v743_v32  ;;  %v919_v31 = vld [vmem:[%s2806_s23 + $0x8b] sm:$0xff] }
  0x61   : > { %2168 = vmatmul.msk.f32.gmra.mxu1 %vm327_vm0, %v289_v33  ;;  %2187 = vmatmul.msk.f32.gmra.mxu2 %vm327_vm0, %v579_v34 }
  0x62   : > { %2225 = vmatmul.msk.f32.gmra.mxu0 %vm327_vm0, %v905_v35  ;;  %2208 = vmatmul.msk.f32.gmra.mxu3 %vm327_vm0, %v744_v36  ;;  %v304_v35 = vld [vmem:[%s2806_s23 + $0x80] sm:$0xff] }
  0x69   : > { %2169 = vmatmul.msk.f32.gmra.mxu1 %vm327_vm0, %v290_v37  ;;  %2188 = vmatmul.msk.f32.gmra.mxu2 %vm327_vm0, %v741_v24  ;;  %v918_v24 = vld [vmem:[%s2806_s23 + $0x83] sm:$0xff] }
  0x6a   : > { %2226 = vmatmul.msk.f32.gmra.mxu0 %vm327_vm0, %v906_v38  ;;  %2209 = vmatmul.msk.f32.gmra.mxu3 %vm327_vm0, %v745_v39  ;;  %v920_v38 = vld [vmem:[%s2806_s23 + $0x93] sm:$0xff] }
  0x71   : > { %2170 = vmatmul.msk.f32.gmra.mxu1 %vm327_vm0, %v291_v40  ;;  %2189 = vmatmul.msk.f32.gmra.mxu2 %vm327_vm0, %v742_v28  ;;  %v303_v28 = vld [vmem:[%s2806_s23 + $0x78] sm:$0xff] }
  0x72   : > { %2227 = vmatmul.msk.f32.gmra.mxu0 %vm327_vm0, %v907_v41  ;;  %2210 = vmatmul.msk.f32.gmra.mxu3 %vm327_vm0, %v746_v42 }
  0x79   : > { %2171 = vmatmul.msk.f32.gmra.mxu1 %vm327_vm0, %v292_v43  ;;  %2190 = vmatmul.msk.f32.gmra.mxu2 %vm327_vm0, %v743_v32  ;;  %v758_v32 = vld [vmem:[%s2806_s23 + $0x9a] sm:$0xff] }
  0x7a   : > { %2228 = vmatmul.msk.f32.gmra.mxu0 %vm327_vm0, %v908_v44  ;;  %2211 = vmatmul.msk.f32.gmra.mxu3 %vm327_vm0, %v747_v45  ;;  %v305_v44 = vld [vmem:[%s2806_s23 + $0x88] sm:$0xff] }
  0x81   : > { %2172 = vmatmul.msk.f32.gmra.mxu1 %vm327_vm0, %v293_v46  ;;  %2191 = vmatmul.msk.f32.gmra.mxu2 %vm327_vm0, %v744_v36 }
  0x82   : > { %2229 = vmatmul.msk.f32.gmra.mxu0 %vm327_vm0, %v909_v47  ;;  %2212 = vmatmul.msk.f32.gmra.mxu3 %vm327_vm0, %v748_v48 }
  0x89   : > { %2173 = vmatmul.msk.f32.gmra.mxu1 %vm327_vm0, %v294_v49  ;;  %2192 = vmatmul.msk.f32.gmra.mxu2 %vm327_vm0, %v745_v39  ;;  %v1393_v39 = vld [vmem:[%s2806_s23 + $0x25] sm:$0xff]  ;;  %v1394_v49 = vld [vmem:[%s2806_s23 + $0x2d] sm:$0xff] }
  0x8a   : > { %2230 = vmatmul.msk.f32.gmra.mxu0 %vm327_vm0, %v910_v50  ;;  %2213 = vmatmul.msk.f32.gmra.mxu3 %vm327_vm0, %v749_v51 }
  0x91   : > { %2174 = vmatmul.msk.f32.gmra.mxu1 %vm327_vm0, %v295_v52  ;;  %2193 = vmatmul.msk.f32.gmra.mxu2 %vm327_vm0, %v746_v42 }
  0x92   : > { %2231 = vmatmul.msk.f32.gmra.mxu0 %vm327_vm0, %v911_v53  ;;  %2214 = vmatmul.msk.f32.gmra.mxu3 %vm327_vm0, %v750_v54 }
  0x99   : > { %2175 = vmatmul.msk.f32.gmra.mxu1 %vm327_vm0, %v296_v55  ;;  %2194 = vmatmul.msk.f32.gmra.mxu2 %vm327_vm0, %v747_v45  ;;  %v1067_v55 = vld [vmem:[%s2806_s23 + $0x14] sm:$0xff] }
  0x9a   : > { %2232 = vmatmul.msk.f32.gmra.mxu0 %vm327_vm0, %v912_v56  ;;  %2215 = vmatmul.msk.f32.gmra.mxu3 %vm327_vm0, %v751_v57  ;;  %v1230_v56 = vld [vmem:[%s2806_s23 + $0x24] sm:$0xff] }
  0xa1   : > { %2176 = vmatmul.msk.f32.gmra.mxu1 %vm327_vm0, %v297_v58  ;;  %2195 = vmatmul.msk.f32.gmra.mxu2 %vm327_vm0, %v748_v48  ;;  %v921_v48 = vld [vmem:[%s2806_s23 + $0x9b] sm:$0xff] }
  0xa2   : > { %2233 = vmatmul.msk.f32.gmra.mxu0 %vm327_vm0, %v913_v59  ;;  %2216 = vmatmul.msk.f32.gmra.mxu3 %vm327_vm0, %v752_v60 }
  0xa9   : > { %2177 = vmatmul.msk.f32.gmra.mxu1 %vm327_vm0, %v298_v61  ;;  %2196 = vmatmul.msk.f32.gmra.mxu2 %vm327_vm0, %v749_v51  ;;  %v1395_v61 = vld [vmem:[%s2806_s23 + $0x35] sm:$0xff] }
  0xaa   : > { %2234 = vmatmul.msk.f32.gmra.mxu0 %vm327_vm0, %v914_v62  ;;  %2217 = vmatmul.msk.f32.gmra.mxu3 %vm327_vm0, %v753_v63 }
  0xae   : > { %v2939_v0 = vpop.f32.mrf.mxu1 }
  0xaf   : > { %v399_v2 = vpop.f32.mrf.mxu0 }
  0xb1   : > { %2178 = vmatmul.msk.f32.gmra.mxu1 %vm327_vm0, %v299_v1  ;;  %2197 = vmatmul.msk.f32.gmra.mxu2 %vm327_vm0, %v750_v54 }
  0xb2   : > { %2235 = vmatmul.msk.f32.gmra.mxu0 %vm327_vm0, %v915_v3  ;;  %2218 = vmatmul.msk.f32.gmra.mxu3 %vm327_vm0, %v754_v4 }
  0xb4   : > { %v2948_v5 = vpop.f32.mrf.mxu2 }
  0xb5   : > { %v2953_v8 = vpop.f32.mrf.mxu3 }
  0xb6   : > { %v2950_v6 = vpop.f32.mrf.mxu1 }
  0xb7   : > { %v2955_v9 = vpop.f32.mrf.mxu0 }
  0xb9   : > { %2179 = vmatmul.msk.f32.gmra.mxu1 %vm327_vm0, %v300_v7  ;;  %2198 = vmatmul.msk.f32.gmra.mxu2 %vm327_vm0, %v751_v57  ;;  %v1231_v7 = vld [vmem:[%s2806_s23 + $0x2c] sm:$0xff] }
  0xba   : > { %2236 = vmatmul.msk.f32.gmra.mxu0 %vm327_vm0, %v916_v10  ;;  %2219 = vmatmul.msk.f32.gmra.mxu3 %vm327_vm0, %v755_v11 }
  0xbc   : > { %v2963_v12 = vpop.f32.mrf.mxu2 }
  0xbd   : > { %v2968_v15 = vpop.f32.mrf.mxu3 }
  0xbe   : > { %v2965_v13 = vpop.f32.mrf.mxu1 }
  0xbf   : > { %v2970_v16 = vpop.f32.mrf.mxu0 }
  0xc1   : > { %2180 = vmatmul.msk.f32.gmra.mxu1 %vm327_vm0, %v301_v14  ;;  %2199 = vmatmul.msk.f32.gmra.mxu2 %vm327_vm0, %v752_v60  ;;  %v1556_v60 = vld [vmem:[%s2806_s23 + $0x26] sm:$0xff]  ;;  %v1557_v14 = vld [vmem:[%s2806_s23 + $0x2e] sm:$0xff] }
  0xc2   : > { %2237 = vmatmul.msk.f32.gmra.mxu0 %vm327_vm0, %v917_v17  ;;  %2220 = vmatmul.msk.f32.gmra.mxu3 %vm327_vm0, %v756_v18  ;;  %v1396_v17 = vld [vmem:[%s2806_s23 + $0x3d] sm:$0xff] }
  0xc4   : > { %v2978_v19 = vpop.f32.mrf.mxu2 }
  0xc5   : > { %v2983_v22 = vpop.f32.mrf.mxu3 }
  0xc6   : > { %v2980_v20 = vpop.f32.mrf.mxu1 }
  0xc7   : > { %v2985_v23 = vpop.f32.mrf.mxu0 }
  0xc9   : > { %2181 = vmatmul.msk.f32.gmra.mxu1 %vm327_vm0, %v302_v21  ;;  %2200 = vmatmul.msk.f32.gmra.mxu2 %vm327_vm0, %v753_v63 }
  0xca   : > { %2238 = vmatmul.msk.f32.gmra.mxu0 %vm327_vm0, %v918_v24  ;;  %2221 = vmatmul.msk.f32.gmra.mxu3 %vm327_vm0, %v757_v25 }
  0xcc   : > { %v2993_v26 = vpop.f32.mrf.mxu2 }
  0xcd   : > { %v832_v29 = vpop.f32.mrf.mxu3 }
  0xce   : > { %v2995_v27 = vpop.f32.mrf.mxu1 }
  0xcf   : > { %v2998_v30 = vpop.f32.mrf.mxu0 }
  0xd1   : > { %2182 = vmatmul.msk.f32.gmra.mxu1 %vm327_vm0, %v303_v28  ;;  %2201 = vmatmul.msk.f32.gmra.mxu2 %vm327_vm0, %v754_v4  ;;  %v1068_v4 = vld [vmem:[%s2806_s23 + $0x1c] sm:$0xff]  ;;  %v1232_v28 = vld [vmem:[%s2806_s23 + $0x34] sm:$0xff] }
  0xd2   : > { %2239 = vmatmul.msk.f32.gmra.mxu0 %vm327_vm0, %v919_v31  ;;  %2222 = vmatmul.msk.f32.gmra.mxu3 %vm327_vm0, %v758_v32 }
  0xd4   : > { %v3006_v33 = vpop.f32.mrf.mxu2 }
  0xd5   : > { %v835_v36 = vpop.f32.mrf.mxu3 }
  0xd6   : > { %v524_v34 = vpop.f32.mrf.mxu1 }
  0xd7   : > { %v995_v37 = vpop.f32.mrf.mxu0  ;;  %v525_v40 = vadd.f32 %v524_v34, %v399_v2  ;;  %v1558_v34 = vld [vmem:[%s2806_s23 + $0x36] sm:$0xff] }
  0xd9   : > { %2183 = vmatmul.msk.f32.gmra.mxu1 %vm327_vm0, %v304_v35  ;;  %2202 = vmatmul.msk.f32.gmra.mxu2 %vm327_vm0, %v755_v11  ;;  %v1397_v35 = vld [vmem:[%s2806_s23 + $0x45] sm:$0xff] }
  0xda   : > { %2240 = vmatmul.msk.f32.gmra.mxu0 %vm327_vm0, %v920_v38  ;;  %2281 = vmatmul.msk.f32.vlgmr.msra.gmra.mxu3 %vm327_vm0, %v1393_v39 }
  0xdc   : > { %v669_v41 = vpop.f32.mrf.mxu2 }
  0xdd   : > { %v723_v42 = vadd.f32 %v669_v41, %v525_v40  ;;  %v838_v45 = vpop.f32.mrf.mxu3  ;;  %v1233_v40 = vld [vmem:[%s2806_s23 + $0x3c] sm:$0xff] }
  0xde   : > { %v527_v43 = vpop.f32.mrf.mxu1 }
  0xdf   : > { %v886_v46 = vadd.f32 %v832_v29, %v723_v42  ;;  %v998_v47 = vpop.f32.mrf.mxu0  ;;  %v528_v51 = vadd.f32 %v527_v43, %v2955_v9 }
  0xe1   : > { %v3018_v50 = vadd.f32 %v995_v37, %v886_v46  ;;  %2184 = vmatmul.msk.f32.gmra.mxu1 %vm327_vm0, %v305_v44  ;;  %2203 = vmatmul.msk.f32.gmra.mxu2 %vm327_vm0, %v756_v18  ;;  %v1559_v44 = vld [vmem:[%s2806_s23 + $0x3e] sm:$0xff] }
  0xe2   : > { %2241 = vmatmul.msk.f32.gmra.mxu0 %vm327_vm0, %v921_v48  ;;  %2282 = vmatmul.msk.f32.gmra.mxu3 %vm327_vm0, %v1394_v49 }
  0xe4   : > { %v672_v52 = vpop.f32.mrf.mxu2 }
  0xe5   : > { %v724_v53 = vadd.f32 %v672_v52, %v528_v51  ;;  %v841_v57 = vpop.f32.mrf.mxu3  ;;  %v1234_v51 = vld [vmem:[%s2806_s23 + $0x44] sm:$0xff] }
  0xe6   : > { %v530_v54 = vpop.f32.mrf.mxu1 }
  0xe7   : > { %v887_v58 = vadd.f32 %v835_v36, %v724_v53  ;;  %v1001_v59 = vpop.f32.mrf.mxu0  ;;  %v531_v63 = vadd.f32 %v530_v54, %v2970_v16 }
  0xe9   : > { %v3029_v62 = vadd.f32 %v998_v47, %v887_v58  ;;  %2243 = vmatmul.msk.f32.vlgmr.msra.gmra.mxu1 %vm327_vm0, %v1067_v55  ;;  %2262 = vmatmul.msk.f32.vlgmr.msra.gmra.mxu2 %vm327_vm0, %v1230_v56  ;;  %v1560_v55 = vld [vmem:[%s2806_s23 + $0x46] sm:$0xff] }
  0xea   : > { %2300 = vmatmul.msk.f32.vlgmr.msra.gmra.mxu0 %vm327_vm0, %v1556_v60  ;;  %2283 = vmatmul.msk.f32.gmra.mxu3 %vm327_vm0, %v1395_v61  ;;  %v1235_v61 = vld [vmem:[%s2806_s23 + $0x4c] sm:$0xff] }
  0xec   : > { %v675_v1 = vpop.f32.mrf.mxu2 }
  0xed   : > { %v725_v2 = vadd.f32 %v675_v1, %v531_v63  ;;  %v844_v9 = vpop.f32.mrf.mxu3 }
  0xee   : > { %v533_v3 = vpop.f32.mrf.mxu1 }
  0xef   : > { %v888_v10 = vadd.f32 %v838_v45, %v725_v2  ;;  %v1004_v11 = vpop.f32.mrf.mxu0  ;;  %v534_v16 = vadd.f32 %v533_v3, %v2985_v23  ;;  %v1398_v45 = vld [vmem:[%s2806_s23 + $0x4d] sm:$0xff] }
  0xf0   : > { %v1561_v3 = vld [vmem:[%s2806_s23 + $0x4e] sm:$0xff] }
  0xf1   : > { %v3040_v18 = vadd.f32 %v1001_v59, %v888_v10  ;;  %2244 = vmatmul.msk.f32.gmra.mxu1 %vm327_vm0, %v1068_v4  ;;  %2263 = vmatmul.msk.f32.gmra.mxu2 %vm327_vm0, %v1231_v7  ;;  %v1400_v4 = vld [vmem:[%s2806_s23 + $0x5d] sm:$0xff] }
  0xf2   : > { %2301 = vmatmul.msk.f32.gmra.mxu0 %vm327_vm0, %v1557_v14  ;;  %2284 = vmatmul.msk.f32.gmra.mxu3 %vm327_vm0, %v1396_v17  ;;  %v1236_v14 = vld [vmem:[%s2806_s23 + $0x54] sm:$0xff] }
  0xf4   : > { %v678_v21 = vpop.f32.mrf.mxu2 }
  0xf5   : > { %v726_v24 = vadd.f32 %v678_v21, %v534_v16  ;;  %v847_v29 = vpop.f32.mrf.mxu3 }
  0xf6   : > { %v536_v25 = vpop.f32.mrf.mxu1 }
  0xf7   : > { %v889_v31 = vadd.f32 %v841_v57, %v726_v24  ;;  %v1007_v32 = vpop.f32.mrf.mxu0  ;;  %v537_v23 = vadd.f32 %v536_v25, %v2998_v30  ;;  %v1562_v24 = vld [vmem:[%s2806_s23 + $0x56] sm:$0xff]  ;;  %v1401_v25 = vld [vmem:[%s2806_s23 + $0x65] sm:$0xff] }
  0xf9   : > { %v3050_v36 = vadd.f32 %v1004_v11, %v889_v31  ;;  %2245 = vmatmul.msk.f32.gmra.mxu1 %vm327_vm0, %v1230_v56  ;;  %2264 = vmatmul.msk.f32.gmra.mxu2 %vm327_vm0, %v1232_v28  ;;  %v1399_v56 = vld [vmem:[%s2806_s23 + $0x55] sm:$0xff] }
  0xfa   : > { %2302 = vmatmul.msk.f32.gmra.mxu0 %vm327_vm0, %v1558_v34  ;;  %2285 = vmatmul.msk.f32.gmra.mxu3 %vm327_vm0, %v1397_v35  ;;  %v1237_v34 = vld [vmem:[%s2806_s23 + $0x5c] sm:$0xff] }
  0xfc   : > { %v681_v37 = vpop.f32.mrf.mxu2 }
  0xfd   : > { %v727_v38 = vadd.f32 %v681_v37, %v537_v23  ;;  %v850_v41 = vpop.f32.mrf.mxu3 }
  0xfe   : > { %v539_v39 = vpop.f32.mrf.mxu1 }
  0xff   : > { %v890_v42 = vadd.f32 %v844_v9, %v727_v38  ;;  %v1010_v43 = vpop.f32.mrf.mxu0  ;;  %v540_v30 = vadd.f32 %v539_v39, %v2939_v0  ;;  %v1563_v38 = vld [vmem:[%s2806_s23 + $0x5e] sm:$0xff]  ;;  %v1402_v39 = vld [vmem:[%s2806_s23 + $0x6d] sm:$0xff] }
 0x101   : > { %v3060_v46 = vadd.f32 %v1007_v32, %v890_v42  ;;  %2246 = vmatmul.msk.f32.gmra.mxu1 %vm327_vm0, %v1231_v7  ;;  %2265 = vmatmul.msk.f32.gmra.mxu2 %vm327_vm0, %v1233_v40 }
 0x102   : > { %2303 = vmatmul.msk.f32.gmra.mxu0 %vm327_vm0, %v1559_v44  ;;  %2286 = vmatmul.msk.f32.gmra.mxu3 %vm327_vm0, %v1398_v45  ;;  %v1238_v44 = vld [vmem:[%s2806_s23 + $0x64] sm:$0xff] }
 0x104   : > { %v684_v47 = vpop.f32.mrf.mxu2 }
 0x105   : > { %v728_v48 = vadd.f32 %v684_v47, %v540_v30  ;;  %v853_v52 = vpop.f32.mrf.mxu3 }
 0x106   : > { %v542_v49 = vpop.f32.mrf.mxu1 }
 0x107   : > { %v891_v53 = vadd.f32 %v847_v29, %v728_v48  ;;  %v1013_v54 = vpop.f32.mrf.mxu0  ;;  %v543_v0 = vadd.f32 %v542_v49, %v2950_v6  ;;  %v1564_v48 = vld [vmem:[%s2806_s23 + $0x66] sm:$0xff]  ;;  %v1403_v49 = vld [vmem:[%s2806_s23 + $0x75] sm:$0xff] }
 0x109   : > { %v3070_v57 = vadd.f32 %v1010_v43, %v891_v53  ;;  %2247 = vmatmul.msk.f32.gmra.mxu1 %vm327_vm0, %v1232_v28  ;;  %2266 = vmatmul.msk.f32.gmra.mxu2 %vm327_vm0, %v1234_v51 }
 0x10a   : > { %2304 = vmatmul.msk.f32.gmra.mxu0 %vm327_vm0, %v1560_v55  ;;  %2287 = vmatmul.msk.f32.gmra.mxu3 %vm327_vm0, %v1399_v56  ;;  %v1239_v55 = vld [vmem:[%s2806_s23 + $0x6c] sm:$0xff] }
 0x10c   : > { %v687_v58 = vpop.f32.mrf.mxu2 }
 0x10d   : > { %v729_v59 = vadd.f32 %v687_v58, %v543_v0  ;;  %v856_v63 = vpop.f32.mrf.mxu3 }
 0x10e   : > { %v545_v60 = vpop.f32.mrf.mxu1 }
 0x10f   : > { %v892_v1 = vadd.f32 %v850_v41, %v729_v59  ;;  %v1016_v2 = vpop.f32.mrf.mxu0  ;;  %v546_v6 = vadd.f32 %v545_v60, %v2965_v13  ;;  %v1565_v59 = vld [vmem:[%s2806_s23 + $0x6e] sm:$0xff]  ;;  %v1404_v60 = vld [vmem:[%s2806_s23 + $0x7d] sm:$0xff] }
 0x111   : > { %v3080_v7 = vadd.f32 %v1013_v54, %v892_v1  ;;  %2248 = vmatmul.msk.f32.gmra.mxu1 %vm327_vm0, %v1233_v40  ;;  %2267 = vmatmul.msk.f32.gmra.mxu2 %vm327_vm0, %v1235_v61 }
 0x112   : > { %2305 = vmatmul.msk.f32.gmra.mxu0 %vm327_vm0, %v1561_v3  ;;  %2288 = vmatmul.msk.f32.gmra.mxu3 %vm327_vm0, %v1400_v4  ;;  %v1240_v3 = vld [vmem:[%s2806_s23 + $0x74] sm:$0xff] }
 0x114   : > { %v690_v9 = vpop.f32.mrf.mxu2 }
 0x115   : > { %v730_v10 = vadd.f32 %v690_v9, %v546_v6  ;;  %v859_v17 = vpop.f32.mrf.mxu3 }
 0x116   : > { %v548_v11 = vpop.f32.mrf.mxu1 }
 0x117   : > { %v893_v16 = vadd.f32 %v853_v52, %v730_v10  ;;  %v1019_v21 = vpop.f32.mrf.mxu0  ;;  %v549_v13 = vadd.f32 %v548_v11, %v2980_v20  ;;  %v1566_v10 = vld [vmem:[%s2806_s23 + $0x76] sm:$0xff]  ;;  %v1405_v11 = vld [vmem:[%s2806_s23 + $0x85] sm:$0xff] }
 0x119   : > { %v3090_v28 = vadd.f32 %v1016_v2, %v893_v16  ;;  %2249 = vmatmul.msk.f32.gmra.mxu1 %vm327_vm0, %v1234_v51  ;;  %2268 = vmatmul.msk.f32.gmra.mxu2 %vm327_vm0, %v1236_v14 }
 0x11a   : > { %2306 = vmatmul.msk.f32.gmra.mxu0 %vm327_vm0, %v1562_v24  ;;  %2289 = vmatmul.msk.f32.gmra.mxu3 %vm327_vm0, %v1401_v25  ;;  %v1241_v24 = vld [vmem:[%s2806_s23 + $0x7c] sm:$0xff] }
 0x11c   : > { %v693_v29 = vpop.f32.mrf.mxu2 }
 0x11d   : > { %v731_v31 = vadd.f32 %v693_v29, %v549_v13  ;;  %v862_v35 = vpop.f32.mrf.mxu3 }
 0x11e   : > { %v551_v32 = vpop.f32.mrf.mxu1 }
 0x11f   : > { %v894_v23 = vadd.f32 %v856_v63, %v731_v31  ;;  %v1022_v37 = vpop.f32.mrf.mxu0  ;;  %v552_v20 = vadd.f32 %v551_v32, %v2995_v27  ;;  %v1567_v31 = vld [vmem:[%s2806_s23 + $0x7e] sm:$0xff]  ;;  %v1406_v32 = vld [vmem:[%s2806_s23 + $0x8d] sm:$0xff] }
 0x121   : > { %v3100_v40 = vadd.f32 %v1019_v21, %v894_v23  ;;  %2250 = vmatmul.msk.f32.gmra.mxu1 %vm327_vm0, %v1235_v61  ;;  %2269 = vmatmul.msk.f32.gmra.mxu2 %vm327_vm0, %v1237_v34 }
 0x122   : > { %2307 = vmatmul.msk.f32.gmra.mxu0 %vm327_vm0, %v1563_v38  ;;  %2290 = vmatmul.msk.f32.gmra.mxu3 %vm327_vm0, %v1402_v39  ;;  %v1242_v38 = vld [vmem:[%s2806_s23 + $0x84] sm:$0xff] }
 0x124   : > { %v696_v41 = vpop.f32.mrf.mxu2 }
 0x125   : > { %v732_v42 = vadd.f32 %v696_v41, %v552_v20  ;;  %v865_v45 = vpop.f32.mrf.mxu3 }
 0x126   : > { %v554_v43 = vpop.f32.mrf.mxu1 }
 0x127   : > { %v895_v30 = vadd.f32 %v859_v17, %v732_v42  ;;  %v1025_v47 = vpop.f32.mrf.mxu0  ;;  %v555_v27 = vadd.f32 %v554_v43, %v2948_v5  ;;  %v1568_v42 = vld [vmem:[%s2806_s23 + $0x86] sm:$0xff]  ;;  %v1407_v43 = vld [vmem:[%s2806_s23 + $0x95] sm:$0xff] }
 0x129   : > { %v3110_v51 = vadd.f32 %v1022_v37, %v895_v30  ;;  %2251 = vmatmul.msk.f32.gmra.mxu1 %vm327_vm0, %v1236_v14  ;;  %2270 = vmatmul.msk.f32.gmra.mxu2 %vm327_vm0, %v1238_v44 }
 0x12a   : > { %2308 = vmatmul.msk.f32.gmra.mxu0 %vm327_vm0, %v1564_v48  ;;  %2291 = vmatmul.msk.f32.gmra.mxu3 %vm327_vm0, %v1403_v49  ;;  %v1243_v48 = vld [vmem:[%s2806_s23 + $0x8c] sm:$0xff] }
 0x12c   : > { %v699_v52 = vpop.f32.mrf.mxu2 }
 0x12d   : > { %v733_v53 = vadd.f32 %v699_v52, %v555_v27  ;;  %v868_v56 = vpop.f32.mrf.mxu3 }
 0x12e   : > { %v557_v54 = vpop.f32.mrf.mxu1 }
 0x12f   : > { %v896_v0 = vadd.f32 %v862_v35, %v733_v53  ;;  %v1028_v58 = vpop.f32.mrf.mxu0  ;;  %v558_v5 = vadd.f32 %v557_v54, %v2963_v12  ;;  %v1569_v53 = vld [vmem:[%s2806_s23 + $0x8e] sm:$0xff]  ;;  %v1408_v54 = vld [vmem:[%s2806_s23 + $0x9d] sm:$0xff] }
 0x131   : > { %v3120_v61 = vadd.f32 %v1025_v47, %v896_v0  ;;  %2252 = vmatmul.msk.f32.gmra.mxu1 %vm327_vm0, %v1237_v34  ;;  %2271 = vmatmul.msk.f32.gmra.mxu2 %vm327_vm0, %v1239_v55 }
 0x132   : > { %2309 = vmatmul.msk.f32.gmra.mxu0 %vm327_vm0, %v1565_v59  ;;  %2292 = vmatmul.msk.f32.gmra.mxu3 %vm327_vm0, %v1404_v60  ;;  %v1244_v59 = vld [vmem:[%s2806_s23 + $0x94] sm:$0xff] }
 0x134   : > { %v702_v63 = vpop.f32.mrf.mxu2 }
 0x135   : > { %v734_v1 = vadd.f32 %v702_v63, %v558_v5  ;;  %v871_v4 = vpop.f32.mrf.mxu3 }
 0x136   : > { %v560_v2 = vpop.f32.mrf.mxu1 }
 0x137   : > { %v897_v6 = vadd.f32 %v865_v45, %v734_v1  ;;  %v1031_v9 = vpop.f32.mrf.mxu0  ;;  %v561_v12 = vadd.f32 %v560_v2, %v2978_v19  ;;  %v1570_v1 = vld [vmem:[%s2806_s23 + $0x96] sm:$0xff]  ;;  %v1409_v2 = vld [vmem:[%s2806_s23 + $0xa5] sm:$0xff] }
 0x139   : > { %v3130_v14 = vadd.f32 %v1028_v58, %v897_v6  ;;  %2253 = vmatmul.msk.f32.gmra.mxu1 %vm327_vm0, %v1238_v44  ;;  %2272 = vmatmul.msk.f32.gmra.mxu2 %vm327_vm0, %v1240_v3 }
 0x13a   : > { %2310 = vmatmul.msk.f32.gmra.mxu0 %vm327_vm0, %v1566_v10  ;;  %2293 = vmatmul.msk.f32.gmra.mxu3 %vm327_vm0, %v1405_v11  ;;  %v1245_v10 = vld [vmem:[%s2806_s23 + $0x9c] sm:$0xff] }
 0x13c   : > { %v705_v17 = vpop.f32.mrf.mxu2 }
 0x13d   : > { %v735_v16 = vadd.f32 %v705_v17, %v561_v12  ;;  %v874_v25 = vpop.f32.mrf.mxu3 }
 0x13e   : > { %v563_v21 = vpop.f32.mrf.mxu1 }
 0x13f   : > { %v898_v13 = vadd.f32 %v868_v56, %v735_v16  ;;  %v1034_v29 = vpop.f32.mrf.mxu0  ;;  %v564_v19 = vadd.f32 %v563_v21, %v2993_v26  ;;  %v1571_v16 = vld [vmem:[%s2806_s23 + $0x9e] sm:$0xff]  ;;  %v1410_v21 = vld [vmem:[%s2806_s23 + $0xad] sm:$0xff] }
 0x141   : > { %v3140_v34 = vadd.f32 %v1031_v9, %v898_v13  ;;  %2254 = vmatmul.msk.f32.gmra.mxu1 %vm327_vm0, %v1239_v55  ;;  %2273 = vmatmul.msk.f32.gmra.mxu2 %vm327_vm0, %v1241_v24 }
 0x142   : > { %2311 = vmatmul.msk.f32.gmra.mxu0 %vm327_vm0, %v1567_v31  ;;  %2294 = vmatmul.msk.f32.gmra.mxu3 %vm327_vm0, %v1406_v32  ;;  %v1246_v31 = vld [vmem:[%s2806_s23 + $0xa4] sm:$0xff] }
 0x144   : > { %v708_v35 = vpop.f32.mrf.mxu2 }
 0x145   : > { %v736_v23 = vadd.f32 %v708_v35, %v564_v19  ;;  %v877_v39 = vpop.f32.mrf.mxu3 }
 0x146   : > { %v566_v37 = vpop.f32.mrf.mxu1 }
 0x147   : > { %v899_v20 = vadd.f32 %v871_v4, %v736_v23  ;;  %v1037_v41 = vpop.f32.mrf.mxu0  ;;  %v567_v26 = vadd.f32 %v566_v37, %v3006_v33  ;;  %v1572_v23 = vld [vmem:[%s2806_s23 + $0xa6] sm:$0xff] }
 0x149   : > { %v3150_v44 = vadd.f32 %v1034_v29, %v899_v20  ;;  %2255 = vmatmul.msk.f32.gmra.mxu1 %vm327_vm0, %v1240_v3  ;;  %2274 = vmatmul.msk.f32.gmra.mxu2 %vm327_vm0, %v1242_v38 }
 0x14a   : > { %2312 = vmatmul.msk.f32.gmra.mxu0 %vm327_vm0, %v1568_v42  ;;  %2295 = vmatmul.msk.f32.gmra.mxu3 %vm327_vm0, %v1407_v43 }
 0x14c   : > { %v711_v45 = vpop.f32.mrf.mxu2 }
 0x14d   : > { %v737_v30 = vadd.f32 %v711_v45, %v567_v26  ;;  %v880_v49 = vpop.f32.mrf.mxu3  ;;  %v1573_v45 = vld [vmem:[%s2806_s23 + $0xae] sm:$0xff] }
 0x14e   : > { %v569_v47 = vpop.f32.mrf.mxu1 }
 0x14f   : > { %v900_v27 = vadd.f32 %v874_v25, %v737_v30  ;;  %v1040_v52 = vpop.f32.mrf.mxu0  ;;  %v570_v33 = vadd.f32 %v569_v47, %v2953_v8 }
 0x151   : > { %v3160_v55 = vadd.f32 %v1037_v41, %v900_v27  ;;  %2256 = vmatmul.msk.f32.gmra.mxu1 %vm327_vm0, %v1241_v24  ;;  %2275 = vmatmul.msk.f32.gmra.mxu2 %vm327_vm0, %v1243_v48  ;;  %v1247_v41 = vld [vmem:[%s2806_s23 + $0xac] sm:$0xff]  ;;  %s3502_s23 = sand.u32 1, %s2584_s19  }
 0x152   : > { %2313 = vmatmul.msk.f32.gmra.mxu0 %vm327_vm0, %v1569_v53  ;;  %2296 = vmatmul.msk.f32.gmra.mxu3 %vm327_vm0, %v1408_v54  ;;  %s3296_s26 = scalar_lea.vmem [#allocation4], %s3502_s23  ;;  %s3503_s27 = smov %s3502_s23 }
 0x153   : > { %s3300_s29 = scalar_lea.vmem [#allocation6], %s3503_s27 }
 0x154   : > { %v714_v56 = vpop.f32.mrf.mxu2 }
 0x155   : > { %v738_v0 = vadd.f32 %v714_v56, %v570_v33  ;;  %v883_v60 = vpop.f32.mrf.mxu3 }
 0x156   : > { %v572_v58 = vpop.f32.mrf.mxu1 }
 0x157   : > { %v901_v5 = vadd.f32 %v877_v39, %v738_v0  ;;  %v1043_v63 = vpop.f32.mrf.mxu0  ;;  %v573_v8 = vadd.f32 %v572_v58, %v2968_v15 }
 0x159   : > { %v3170_v3 = vadd.f32 %v1040_v52, %v901_v5  ;;  %2257 = vmatmul.msk.f32.gmra.mxu1 %vm327_vm0, %v1242_v38  ;;  %2276 = vmatmul.msk.f32.gmra.mxu2 %vm327_vm0, %v1244_v59 }
 0x15a   : > { %2314 = vmatmul.msk.f32.gmra.mxu0 %vm327_vm0, %v1570_v1  ;;  %2297 = vmatmul.msk.f32.gmra.mxu3 %vm327_vm0, %v1409_v2 }
 0x15c   : > { %v717_v4 = vpop.f32.mrf.mxu2 }
 0x15d   : > { %v739_v6 = vadd.f32 %v717_v4, %v573_v8  ;;  %v1484_v11 = vpop.f32.mrf.mxu3 }
 0x15e   : > { %v575_v9 = vpop.f32.mrf.mxu1 }
 0x15f   : > { %v902_v12 = vadd.f32 %v880_v49, %v739_v6  ;;  %v1046_v17 = vpop.f32.mrf.mxu0  ;;  %v576_v15 = vadd.f32 %v575_v9, %v2983_v22 }
 0x161   : > { %v3180_v24 = vadd.f32 %v1043_v63, %v902_v12  ;;  %2258 = vmatmul.msk.f32.gmra.mxu1 %vm327_vm0, %v1243_v48  ;;  %2277 = vmatmul.msk.f32.gmra.mxu2 %vm327_vm0, %v1245_v10 }
 0x162   : > { %2315 = vmatmul.msk.f32.gmra.mxu0 %vm327_vm0, %v1571_v16  ;;  %2298 = vmatmul.msk.f32.gmra.mxu3 %vm327_vm0, %v1410_v21 }
 0x164   : > { %v720_v25 = vpop.f32.mrf.mxu2 }
 0x165   : > { %v740_v13 = vadd.f32 %v720_v25, %v576_v15  ;;  %v1487_v32 = vpop.f32.mrf.mxu3 }
 0x166   : > { %v1158_v29 = vpop.f32.mrf.mxu1 }
 0x167   : > { %v903_v19 = vadd.f32 %v883_v60, %v740_v13  ;;  %v1647_v35 = vpop.f32.mrf.mxu0  ;;  %v1212_v22 = vadd.f32 %v1158_v29, %v3018_v50 }
 0x169   : > { %v3189_v37 = vadd.f32 %v1046_v17, %v903_v19  ;;  %2259 = vmatmul.msk.f32.gmra.mxu1 %vm327_vm0, %v1244_v59  ;;  %2278 = vmatmul.msk.f32.gmra.mxu2 %vm327_vm0, %v1246_v31 }
 0x16a   : > { %2316 = vmatmul.msk.f32.gmra.mxu0 %vm327_vm0, %v1572_v23 }
 0x16c   : > { %v1321_v38 = vpop.f32.mrf.mxu2 }
 0x16d   : > { %v1375_v39 = vadd.f32 %v1321_v38, %v1212_v22  ;;  %v1490_v42 = vpop.f32.mrf.mxu3 }
 0x16e   : > { %v1161_v20 = vpop.f32.mrf.mxu1 }
 0x16f   : > { %v1538_v43 = vadd.f32 %v1484_v11, %v1375_v39  ;;  %v1650_v26 = vpop.f32.mrf.mxu0  ;;  %v1213_v50 = vadd.f32 %v1161_v20, %v3029_v62 }
 0x171   : > { %v3200_v30 = vadd.f32 %v1647_v35, %v1538_v43  ;;  %2260 = vmatmul.msk.f32.gmra.mxu1 %vm327_vm0, %v1245_v10  ;;  %2279 = vmatmul.msk.f32.gmra.mxu2 %vm327_vm0, %v1247_v41 }
 0x172   : > { %2317 = vmatmul.msk.f32.gmra.mxu0 %vm327_vm0, %v1573_v45 }
 0x173   : > { %1719 = vst [vmem:[%s3206_s10] sm:$0xff] %v3200_v30 }
 0x174   : > { %v1324_v47 = vpop.f32.mrf.mxu2 }
 0x175   : > { %v1376_v48 = vadd.f32 %v1324_v47, %v1213_v50  ;;  %v1493_v27 = vpop.f32.mrf.mxu3 }
 0x176   : > { %v1164_v49 = vpop.f32.mrf.mxu1 }
 0x177   : > { %v1539_v52 = vadd.f32 %v1487_v32, %v1376_v48  ;;  %v1653_v53 = vpop.f32.mrf.mxu0  ;;  %v1214_v33 = vadd.f32 %v1164_v49, %v3040_v18 }
 0x179   : > { %v3210_v54 = vadd.f32 %v1650_v26, %v1539_v52 }
 0x17b   : > { %1720 = vst [vmem:[%s3206_s10 + $0x8] sm:$0xff] %v3210_v54 }
 0x17c   : > { %v1327_v62 = vpop.f32.mrf.mxu2 }
 0x17d   : > { %v1377_v56 = vadd.f32 %v1327_v62, %v1214_v33  ;;  %v1496_v58 = vpop.f32.mrf.mxu3 }
 0x17e   : > { %v1167_v0 = vpop.f32.mrf.mxu1 }
 0x17f   : > { %v1540_v59 = vadd.f32 %v1490_v42, %v1377_v56  ;;  %v1656_v60 = vpop.f32.mrf.mxu0  ;;  %v1215_v63 = vadd.f32 %v1167_v0, %v3050_v36 }
 0x181   : > { %v3215_v5 = vadd.f32 %v1653_v53, %v1540_v59 }
 0x183   : > { %1721 = vst [vmem:[%s3206_s10 + $0x10] sm:$0xff] %v3215_v5 }
 0x184   : > { %v1330_v1 = vpop.f32.mrf.mxu2 }
 0x185   : > { %v1378_v2 = vadd.f32 %v1330_v1, %v1215_v63  ;;  %v1499_v18 = vpop.f32.mrf.mxu3 }
 0x186   : > { %v1170_v8 = vpop.f32.mrf.mxu1 }
 0x187   : > { %v1541_v4 = vadd.f32 %v1493_v27, %v1378_v2  ;;  %v1659_v6 = vpop.f32.mrf.mxu0  ;;  %v1216_v10 = vadd.f32 %v1170_v8, %v3060_v46 }
 0x189   : > { %v3220_v9 = vadd.f32 %v1656_v60, %v1541_v4 }
 0x18b   : > { %1722 = vst [vmem:[%s3206_s10 + $0x18] sm:$0xff] %v3220_v9 }
 0x18c   : > { %v1333_v11 = vpop.f32.mrf.mxu2 }
 0x18d   : > { %v1379_v12 = vadd.f32 %v1333_v11, %v1216_v10  ;;  %v1502_v36 = vpop.f32.mrf.mxu3 }
 0x18e   : > { %v1173_v17 = vpop.f32.mrf.mxu1 }
 0x18f   : > { %v1542_v16 = vadd.f32 %v1496_v58, %v1379_v12  ;;  %v1662_v21 = vpop.f32.mrf.mxu0  ;;  %v1217_v25 = vadd.f32 %v1173_v17, %v3070_v57 }
 0x191   : > { %v3225_v15 = vadd.f32 %v1659_v6, %v1542_v16 }
 0x193   : > { %1723 = vst [vmem:[%s3206_s10 + $0x20] sm:$0xff] %v3225_v15 }
 0x194   : > { %v1336_v13 = vpop.f32.mrf.mxu2 }
 0x195   : > { %v1380_v29 = vadd.f32 %v1336_v13, %v1217_v25  ;;  %v1505_v46 = vpop.f32.mrf.mxu3 }
 0x196   : > { %v1176_v31 = vpop.f32.mrf.mxu1 }
 0x197   : > { %v1543_v32 = vadd.f32 %v1499_v18, %v1380_v29  ;;  %v1665_v19 = vpop.f32.mrf.mxu0  ;;  %v1218_v23 = vadd.f32 %v1176_v31, %v3080_v7 }
 0x199   : > { %v3230_v35 = vadd.f32 %v1662_v21, %v1543_v32 }
 0x19b   : > { %1724 = vst [vmem:[%s3206_s10 + $0x28] sm:$0xff] %v3230_v35 }
 0x19c   : > { %v1339_v22 = vpop.f32.mrf.mxu2 }
 0x19d   : > { %v1381_v38 = vadd.f32 %v1339_v22, %v1218_v23  ;;  %v1508_v57 = vpop.f32.mrf.mxu3 }
 0x19e   : > { %v1179_v39 = vpop.f32.mrf.mxu1 }
 0x19f   : > { %v1544_v20 = vadd.f32 %v1502_v36, %v1381_v38  ;;  %v1668_v41 = vpop.f32.mrf.mxu0  ;;  %v1219_v43 = vadd.f32 %v1179_v39, %v3090_v28 }
 0x1a1   : > { %v3235_v42 = vadd.f32 %v1665_v19, %v1544_v20 }
 0x1a3   : > { %1725 = vst [vmem:[%s3206_s10 + $0x30] sm:$0xff] %v3235_v42 }
 0x1a4   : > { %v1342_v26 = vpop.f32.mrf.mxu2 }
 0x1a5   : > { %v1382_v45 = vadd.f32 %v1342_v26, %v1219_v43  ;;  %v1511_v7 = vpop.f32.mrf.mxu3 }
 0x1a6   : > { %v1182_v50 = vpop.f32.mrf.mxu1 }
 0x1a7   : > { %v1545_v47 = vadd.f32 %v1505_v46, %v1382_v45  ;;  %v1671_v48 = vpop.f32.mrf.mxu0  ;;  %v1220_v27 = vadd.f32 %v1182_v50, %v3100_v40 }
 0x1a9   : > { %v3240_v49 = vadd.f32 %v1668_v41, %v1545_v47 }
 0x1ab   : > { %1726 = vst [vmem:[%s3206_s10 + $0x38] sm:$0xff] %v3240_v49 }
 0x1ac   : > { %v1345_v52 = vpop.f32.mrf.mxu2 }
 0x1ad   : > { %v1383_v53 = vadd.f32 %v1345_v52, %v1220_v27  ;;  %v1514_v28 = vpop.f32.mrf.mxu3 }
 0x1ae   : > { %v1185_v33 = vpop.f32.mrf.mxu1 }
 0x1af   : > { %v1546_v62 = vadd.f32 %v1508_v57, %v1383_v53  ;;  %v1674_v56 = vpop.f32.mrf.mxu0  ;;  %v1221_v58 = vadd.f32 %v1185_v33, %v3110_v51 }
 0x1b1   : > { %v3245_v0 = vadd.f32 %v1671_v48, %v1546_v62 }
 0x1b3   : > { %1727 = vst [vmem:[%s3206_s10 + $0x40] sm:$0xff] %v3245_v0 }
 0x1b4   : > { %v1348_v59 = vpop.f32.mrf.mxu2 }
 0x1b5   : > { %v1384_v60 = vadd.f32 %v1348_v59, %v1221_v58  ;;  %v1517_v2 = vpop.f32.mrf.mxu3 }
 0x1b6   : > { %v1188_v63 = vpop.f32.mrf.mxu1 }
 0x1b7   : > { %v1547_v40 = vadd.f32 %v1511_v7, %v1384_v60  ;;  %v1677_v1 = vpop.f32.mrf.mxu0  ;;  %v1222_v18 = vadd.f32 %v1188_v63, %v3120_v61 }
 0x1b9   : > { %v3250_v8 = vadd.f32 %v1674_v56, %v1547_v40 }
 0x1bb   : > { %1728 = vst [vmem:[%s3206_s10 + $0x48] sm:$0xff] %v3250_v8 }
 0x1bc   : > { %v1351_v4 = vpop.f32.mrf.mxu2 }
 0x1bd   : > { %v1385_v6 = vadd.f32 %v1351_v4, %v1222_v18  ;;  %v1520_v17 = vpop.f32.mrf.mxu3 }
 0x1be   : > { %v1191_v10 = vpop.f32.mrf.mxu1 }
 0x1bf   : > { %v1548_v51 = vadd.f32 %v1514_v28, %v1385_v6  ;;  %v1680_v11 = vpop.f32.mrf.mxu0  ;;  %v1223_v36 = vadd.f32 %v1191_v10, %v3130_v14 }
 0x1c1   : > { %v3255_v12 = vadd.f32 %v1677_v1, %v1548_v51 }
 0x1c3   : > { %1729 = vst [vmem:[%s3206_s10 + $0x50] sm:$0xff] %v3255_v12 }
 0x1c4   : > { %v1354_v16 = vpop.f32.mrf.mxu2 }
 0x1c5   : > { %v1386_v21 = vadd.f32 %v1354_v16, %v1223_v36  ;;  %v1523_v32 = vpop.f32.mrf.mxu3 }
 0x1c6   : > { %v1194_v25 = vpop.f32.mrf.mxu1 }
 0x1c7   : > { %v1549_v61 = vadd.f32 %v1517_v2, %v1386_v21  ;;  %v1683_v13 = vpop.f32.mrf.mxu0  ;;  %v1224_v31 = vadd.f32 %v1194_v25, %v3140_v34 }
 0x1c9   : > { %v3260_v29 = vadd.f32 %v1680_v11, %v1549_v61 }
 0x1cb   : > { %1730 = vst [vmem:[%s3206_s10 + $0x58] sm:$0xff] %v3260_v29 }
 0x1cc   : > { %v1357_v46 = vpop.f32.mrf.mxu2 }
 0x1cd   : > { %v1387_v19 = vadd.f32 %v1357_v46, %v1224_v31  ;;  %v1526_v34 = vpop.f32.mrf.mxu3 }
 0x1ce   : > { %v1197_v23 = vpop.f32.mrf.mxu1 }
 0x1cf   : > { %v1550_v14 = vadd.f32 %v1520_v17, %v1387_v19  ;;  %v1686_v22 = vpop.f32.mrf.mxu0  ;;  %v1225_v39 = vadd.f32 %v1197_v23, %v3150_v44 }
 0x1d1   : > { %v3265_v38 = vadd.f32 %v1683_v13, %v1550_v14 }
 0x1d3   : > { %1731 = vst [vmem:[%s3206_s10 + $0x60] sm:$0xff] %v3265_v38 }
 0x1d4   : > { %v1360_v57 = vpop.f32.mrf.mxu2 }
 0x1d5   : > { %v1388_v20 = vadd.f32 %v1360_v57, %v1225_v39  ;;  %v1529_v27 = vpop.f32.mrf.mxu3 }
 0x1d6   : > { %v1200_v41 = vpop.f32.mrf.mxu1 }
 0x1d7   : > { %v1551_v43 = vadd.f32 %v1523_v32, %v1388_v20  ;;  %v1689_v26 = vpop.f32.mrf.mxu0  ;;  %v1226_v50 = vadd.f32 %v1200_v41, %v3160_v55 }
 0x1d9   : > { %v3270_v45 = vadd.f32 %v1686_v22, %v1551_v43 }
 0x1db   : > { %1732 = vst [vmem:[%s3206_s10 + $0x68] sm:$0xff] %v3270_v45 }
 0x1dc   : > { %v1363_v7 = vpop.f32.mrf.mxu2 }
 0x1dd   : > { %v1389_v47 = vadd.f32 %v1363_v7, %v1226_v50  ;;  %v1532_v59 = vpop.f32.mrf.mxu3 }
 0x1de   : > { %v1203_v48 = vpop.f32.mrf.mxu1 }
 0x1df   : > { %v1552_v44 = vadd.f32 %v1526_v34, %v1389_v47  ;;  %v1692_v53 = vpop.f32.mrf.mxu0  ;;  %v1227_v33 = vadd.f32 %v1203_v48, %v3170_v3 }
 0x1e1   : > { %v3275_v52 = vadd.f32 %v1689_v26, %v1552_v44 }
 0x1e3   : > { %1733 = vst [vmem:[%s3206_s10 + $0x70] sm:$0xff] %v3275_v52 }
 0x1e4   : > { %v1366_v28 = vpop.f32.mrf.mxu2 }
 0x1e5   : > { %v1390_v62 = vadd.f32 %v1366_v28, %v1227_v33  ;;  %v1535_v10 = vpop.f32.mrf.mxu3 }
 0x1e6   : > { %v1206_v56 = vpop.f32.mrf.mxu1 }
 0x1e7   : > { %v1553_v55 = vadd.f32 %v1529_v27, %v1390_v62  ;;  %v1228_v60 = vadd.f32 %v1206_v56, %v3180_v24  ;;  %v1695_v40 = vpop.f32.mrf.mxu0 }
 0x1e9   : > { %v3280_v58 = vadd.f32 %v1692_v53, %v1553_v55 }
 0x1eb   : > { %1734 = vst [vmem:[%s3206_s10 + $0x78] sm:$0xff] %v3280_v58 }
 0x1ec   : > { %v1369_v63 = vpop.f32.mrf.mxu2 }
 0x1ed   : > { %v1391_v3 = vadd.f32 %v1369_v63, %v1228_v60 }
 0x1ee   : > { %v1209_v2 = vpop.f32.mrf.mxu1 }
 0x1ef   : > { %v1554_v1 = vadd.f32 %v1532_v59, %v1391_v3  ;;  %v1229_v4 = vadd.f32 %v1209_v2, %v3189_v37  ;;  %v1698_v24 = vpop.f32.mrf.mxu0 }
 0x1f1   : > { %v3285_v18 = vadd.f32 %v1695_v40, %v1554_v1 }
 0x1f3   : > { %1735 = vst [vmem:[%s3206_s10 + $0x80] sm:$0xff] %v3285_v18 }
 0x1f4   : > { %v1372_v6 = vpop.f32.mrf.mxu2 }
 0x1f5   : > { %v1392_v51 = vadd.f32 %v1372_v6, %v1229_v4 }
 0x1f7   : > { %v1555_v11 = vadd.f32 %v1535_v10, %v1392_v51  ;;  %1740 = sbr.rel (%p2318_p6) target bundleno = 511 (0x1ff), region = 36 }
 0x1f9   : > { %v3290_v17 = vadd.f32 %v1698_v24, %v1555_v11 }
 0x1fb   : > { %1736 = vst [vmem:[%s3206_s10 + $0x88] sm:$0xff] %v3290_v17 }
 0x1fc   : > { %v2622_v37 = vmov 0.0  }
 0x1fd   : > { %1741 = vst [vmem:[%s3296_s26] sm:$0x1] %v2622_v37 }
 0x1fe   : > { %1742 = vst [vmem:[%s3300_s29] sm:$0x1] %v2622_v37 }
 0x1ff PF: > { %v1747_v36 = vld [vmem:[%s2801_s18 + $0x20] sm:$0xff]  ;;  %v1745_v16 = vld [vmem:[%s2801_s18 + $0x10] sm:$0xff]  ;;  %v2623_v25 = vmov 0   ;;  %v1748_v61 = vld [vmem:[%s2801_s18 + $0x28] sm:$0xff]  ;;  %s1955_s15 = smul.u32 18, %s2604_s24  ;;  %s1962_s27 = sshll.u32 %s3206_s10, 4  ;;  %s1963_s27 = int_to_ptr.vmem [resolvable:$true] %s1962_s27 }
 0x200   : > { %v1743_v21 = vld [vmem:[%s2801_s18] sm:$0xff]  ;;  %2441 = vset.pattern.permute.xlu2 %v2623_v25  ;;  %2440 = vset.pattern.permute.xlu1 %v2623_v25  ;;  %v1746_v13 = vld [vmem:[%s2801_s18 + $0x18] sm:$0xff]  ;;  %v1744_v31 = vld [vmem:[%s2801_s18 + $0x8] sm:$0xff]  ;;  %s2329_s8 = smul.u32 36, %s2608_s25  ;;  %s3504_s0 = sand.u32 1, %s2596_s22  }
 0x201   : > { %2439 = vset.pattern.permute.xlu0 %v2623_v25  ;;  %1783 = vperm.xlu2 %2441, %v1747_v36   ;;  %v1751_v46 = vld [vmem:[%s2801_s18 + $0x40] sm:$0xff]  ;;  %v1750_v32 = vld [vmem:[%s2801_s18 + $0x38] sm:$0xff]  ;;  %v1749_v19 = vld [vmem:[%s2801_s18 + $0x30] sm:$0xff]  ;;  %s1940_s1 = scalar_lea.sflag [#allocation3], %s3504_s0 }
 0x202   : > { %1773 = vperm.xlu1 %2440, %v1745_v16   ;;  %1763 = vperm.xlu0 %2439, %v1743_v21   ;;  %v1754_v23 = vld [vmem:[%s2801_s18 + $0x58] sm:$0xff]  ;;  %v1753_v14 = vld [vmem:[%s2801_s18 + $0x50] sm:$0xff]  ;;  %v1752_v22 = vld [vmem:[%s2801_s18 + $0x48] sm:$0xff]  ;;  %s1959_s9 = sadd.s32 %s2329_s8, %s1955_s15  ;;  %s2462_s8 = scalar_lea.hbm %s3473_s3, 576 }
 0x203   : > { %v1757_v39 = vld [vmem:[%s2801_s18 + $0x70] sm:$0xff]  ;;  %v1756_v57 = vld [vmem:[%s2801_s18 + $0x68] sm:$0xff]  ;;  %v1755_v20 = vld [vmem:[%s2801_s18 + $0x60] sm:$0xff]  ;;  %s2319_s12 = sshll.u32 %s1959_s9, 3 }
 0x204   : > { %v1760_v41 = vld [vmem:[%s2801_s18 + $0x88] sm:$0xff]  ;;  %v1759_v34 = vld [vmem:[%s2801_s18 + $0x80] sm:$0xff]  ;;  %v1758_v43 = vld [vmem:[%s2801_s18 + $0x78] sm:$0xff]  ;;  %s1961_s23 = scalar_lea.hbm %s3473_s3, %s2319_s12 }
 0x205   : > { %s1964_s16 = sshll.u32 %s1961_s23, 4  ;;  %s1965_s16 = int_to_ptr.hbm [resolvable:$true] %s1964_s16 }
 0x206   : > { %s2456_s2 = sshra.s32 %s1965_s16, 4  ;;  %s2457_s2 = int_to_ptr.hbm [resolvable:$true] %s2456_s2 }
 0x207   : > { %s2458_s18 = scalar_lea.hbm %s2457_s2, 144  ;;  %p2463_p11 = scmp.lt.s32.totalorder %s2457_s2, %s3473_s3 }
 0x208   : > { %p2459_p8 = scmp.ne.s32.totalorder %s2457_s2, %s2458_s18  ;;  %p2464_p0 = scmp.lt.s32.totalorder %s2462_s8, %s2458_s18 }
 0x209   : > { %1788 = vperm.xlu2 %2441, %v1748_v61  }
 0x20a   : > { %1778 = vperm.xlu1 %2440, %v1746_v13   ;;  %1768 = vperm.xlu0 %2439, %v1744_v31   ;;  %p2460_p9 = pnand %p2459_p8, %p2731_p3  ;;  %p2465_p1 = por %p2464_p0, %p2463_p11 }
 0x20c   : > { %p2461_p10 = pneg %p2460_p9 }
 0x20e   : > { %p2466_p4 = pnand %p2465_p1, %p2461_p10 }
 0x211   : > { %1803 = vperm.xlu2 %2441, %v1751_v46  }
 0x212   : > { %1798 = vperm.xlu1 %2440, %v1750_v32   ;;  %1793 = vperm.xlu0 %2439, %v1749_v19  }
 0x219   : > { %1818 = vperm.xlu2 %2441, %v1754_v23  }
 0x21a   : > { %1813 = vperm.xlu1 %2440, %v1753_v14   ;;  %1808 = vperm.xlu0 %2439, %v1752_v22  }
 0x221   : > { %1833 = vperm.xlu2 %2441, %v1757_v39  }
 0x222   : > { %1828 = vperm.xlu1 %2440, %v1756_v57   ;;  %1823 = vperm.xlu0 %2439, %v1755_v20  }
 0x229   : > { %1848 = vperm.xlu2 %2441, %v1760_v41  }
 0x22a   : > { %1843 = vperm.xlu1 %2440, %v1759_v34   ;;  %1838 = vperm.xlu0 %2439, %v1758_v43  }
 0x22b   : > { %2469 = shalt.err (!%p2466_p4)
}
 0x22c   : > { %s2624_s0 = smov 128   ;;  %s2625_s10 = smov 8  }
 0x22d   : > { %2330 = dma.vmem_to_hbm [thread:$0]  (%p2731_p3), %s1963_s27, 2304, %s1965_s16, %s1940_s1, %s2624_s0, %s2624_s0, %s2625_s10  }
 0x22e   : > { %s1976_s11 = scalar_lea.hbm %s3474_s4, %s2608_s25  ;;  %s3505_s16 = sadd.s32 4294967295, %s2620_s28  }
 0x22f   : > { %s3383_s12 = sand.u32 1, %s3505_s16   ;;  %s1989_s27 = scalar_lea.hbm %s3475_s5, %s2608_s25 }
 0x230   : > { %s1978_s18 = sshll.u32 %s3296_s26, 4  ;;  %s3391_s24 = sshll.u32 %s1976_s11, 4  ;;  %s1979_s18 = int_to_ptr.vmem [resolvable:$true] %s1978_s18  ;;  %s1981_s24 = int_to_ptr.hbm [resolvable:$true] %s3391_s24 }
 0x231   : > { %s1991_s15 = sshll.u32 %s3300_s29, 4  ;;  %s3395_s8 = sshll.u32 %s1989_s27, 4  ;;  %s3399_s15 = int_to_ptr.vmem [resolvable:$true] %s1991_s15  ;;  %s1994_s8 = int_to_ptr.hbm [resolvable:$true] %s3395_s8 }
 0x232   : > { %s1945_s25 = scalar_lea.sflag [#allocation5], %s3383_s12  ;;  %s2484_s9 = sshra.s32 %s1981_s24, 4  ;;  %s2485_s9 = int_to_ptr.hbm [resolvable:$true] %s2484_s9 }
 0x233   : > { %s2486_s13 = scalar_lea.hbm %s2485_s9, 1  ;;  %s2490_s1 = scalar_lea.hbm %s3474_s4, 2 }
 0x234   : > { %p2487_p3 = scmp.ne.s32.totalorder %s2485_s9, %s2486_s13  ;;  %p2491_p6 = scmp.lt.s32.totalorder %s2485_s9, %s3474_s4 }
 0x235   : > { %p2492_p8 = scmp.lt.s32.totalorder %s2490_s1, %s2486_s13 }
 0x236   : > { %p2488_p2 = pnand %p2487_p3, %p2760_p12 }
 0x237   : > { %p2493_p9 = por %p2492_p8, %p2491_p6 }
 0x238   : > { %p2489_p5 = pneg %p2488_p2 }
 0x23a   : > { %p2494_p10 = pnand %p2493_p9, %p2489_p5 }
 0x25b   : > { %v1784_v26 = vpop.permute.xlu2 %1783 }
 0x25c   : > { %v1855_v60 = vmul.f32 %v1784_v26, %v3225_v15 }
 0x263   : > { %v1789_v50 = vpop.permute.xlu2 %1788 }
 0x264   : > { %v1856_v1 = vmul.f32 %v1789_v50, %v3230_v35 }
 0x266   : > { %v1901_v37 = vmul.f32 %v1856_v1, %v3230_v35 }
 0x26b   : > { %v1804_v53 = vpop.permute.xlu2 %1803 }
 0x26c   : > { %v1859_v25 = vmul.f32 %v1804_v53, %v3245_v0 }
 0x26e   : > { %v1904_v32 = vmul.f32 %v1859_v25, %v3245_v0 }
 0x273   : > { %v1819_v36 = vpop.permute.xlu2 %1818 }
 0x274   : > { %v1774_v7 = vpop.permute.xlu1 %1773  ;;  %v1764_v47 = vpop.permute.xlu0 %1763 }
 0x275   : > { %v1851_v48 = vmul.f32 %v1764_v47, %v3200_v30  ;;  %v1853_v33 = vmul.f32 %v1774_v7, %v3215_v5 }
 0x277   : > { %v1896_v62 = vmul.f32 %v1851_v48, %v3200_v30  ;;  %v1898_v63 = vmul.f32 %v1853_v33, %v3215_v5  ;;  %v1900_v30 = vmul.f32 %v1855_v60, %v3225_v15 }
 0x27b   : > { %v1834_v34 = vpop.permute.xlu2 %1833 }
 0x27c   : > { %v1779_v44 = vpop.permute.xlu1 %1778  ;;  %v1769_v27 = vpop.permute.xlu0 %1768 }
 0x27d   : > { %v1852_v28 = vmul.f32 %v1769_v27, %v3210_v54  ;;  %v1854_v56 = vmul.f32 %v1779_v44, %v3220_v9 }
 0x27f   : > { %v1870_v55 = vadd.f32 %v1852_v28, %v1851_v48  ;;  %v1897_v59 = vmul.f32 %v1852_v28, %v3210_v54  ;;  %v1899_v2 = vmul.f32 %v1854_v56, %v3220_v9  ;;  %v1865_v28 = vmul.f32 %v1834_v34, %v3275_v52 }
 0x281   : > { %v1871_v40 = vadd.f32 %v1870_v55, %v1853_v33  ;;  %v1914_v3 = vadd.f32 %v1897_v59, %v1896_v62 }
 0x283   : > { %v1872_v4 = vadd.f32 %v1871_v40, %v1854_v56  ;;  %v1915_v6 = vadd.f32 %v1914_v3, %v1898_v63  ;;  %v1849_v55 = vpop.permute.xlu2 %1848 }
 0x284   : > { %v1799_v10 = vpop.permute.xlu1 %1798  ;;  %v1794_v51 = vpop.permute.xlu0 %1793 }
 0x285   : > { %v1916_v24 = vadd.f32 %v1915_v6, %v1899_v2  ;;  %v1873_v11 = vadd.f32 %v1872_v4, %v1855_v60  ;;  %v1857_v54 = vmul.f32 %v1794_v51, %v3235_v42  ;;  %v1858_v5 = vmul.f32 %v1799_v10, %v3240_v49 }
 0x286   : > { %v1868_v2 = vmul.f32 %v1849_v55, %v3290_v17 }
 0x287   : > { %v1874_v16 = vadd.f32 %v1873_v11, %v1856_v1  ;;  %v1917_v21 = vadd.f32 %v1916_v24, %v1900_v30  ;;  %v1902_v13 = vmul.f32 %v1857_v54, %v3235_v42  ;;  %v1903_v31 = vmul.f32 %v1858_v5, %v3240_v49 }
 0x288   : > { %v1862_v42 = vmul.f32 %v1819_v36, %v3260_v29 }
 0x289   : > { %v1918_v9 = vadd.f32 %v1917_v21, %v1901_v37  ;;  %v1875_v61 = vadd.f32 %v1874_v16, %v1857_v54 }
 0x28a   : > { %v1907_v47 = vmul.f32 %v1862_v42, %v3260_v29  ;;  %v1910_v29 = vmul.f32 %v1865_v28, %v3275_v52  ;;  %v1913_v52 = vmul.f32 %v1868_v2, %v3290_v17 }
 0x28b   : > { %v1876_v15 = vadd.f32 %v1875_v61, %v1858_v5  ;;  %v1919_v46 = vadd.f32 %v1918_v9, %v1902_v13  ;;  %v1895_v13 = vld [vmem:[%s3300_s29] sm:$0x1] }
 0x28c   : > { %v1814_v19 = vpop.permute.xlu1 %1813  ;;  %v1809_v23 = vpop.permute.xlu0 %1808 }
 0x28d   : > { %v1920_v35 = vadd.f32 %v1919_v46, %v1903_v31  ;;  %v1861_v14 = vmul.f32 %v1814_v19, %v3255_v12  ;;  %v1877_v22 = vadd.f32 %v1876_v15, %v1859_v25  ;;  %v1860_v39 = vmul.f32 %v1809_v23, %v3250_v8  ;;  %v1869_v25 = vld [vmem:[%s3296_s26] sm:$0x1] }
 0x28f   : > { %v1921_v57 = vadd.f32 %v1920_v35, %v1904_v32  ;;  %v1878_v20 = vadd.f32 %v1877_v22, %v1860_v39  ;;  %v1905_v41 = vmul.f32 %v1860_v39, %v3250_v8  ;;  %v1906_v49 = vmul.f32 %v1861_v14, %v3255_v12 }
 0x291   : > { %v1879_v43 = vadd.f32 %v1878_v20, %v1861_v14  ;;  %v1922_v26 = vadd.f32 %v1921_v57, %v1905_v41 }
 0x293   : > { %v1923_v0 = vadd.f32 %v1922_v26, %v1906_v49  ;;  %v1880_v44 = vadd.f32 %v1879_v43, %v1862_v42 }
 0x294   : > { %v1829_v50 = vpop.permute.xlu1 %1828  ;;  %v1824_v7 = vpop.permute.xlu0 %1823 }
 0x295   : > { %v1864_v48 = vmul.f32 %v1829_v50, %v3270_v45  ;;  %v1863_v27 = vmul.f32 %v1824_v7, %v3265_v38  ;;  %v1924_v53 = vadd.f32 %v1923_v0, %v1907_v47 }
 0x297   : > { %v1881_v33 = vadd.f32 %v1880_v44, %v1863_v27  ;;  %v1908_v8 = vmul.f32 %v1863_v27, %v3265_v38  ;;  %v1909_v12 = vmul.f32 %v1864_v48, %v3270_v45 }
 0x299   : > { %v1882_v62 = vadd.f32 %v1881_v33, %v1864_v48  ;;  %v1925_v56 = vadd.f32 %v1924_v53, %v1908_v8 }
 0x29b   : > { %v1926_v59 = vadd.f32 %v1925_v56, %v1909_v12  ;;  %v1883_v3 = vadd.f32 %v1882_v62, %v1865_v28 }
 0x29c   : > { %v1844_v60 = vpop.permute.xlu1 %1843  ;;  %v1839_v63 = vpop.permute.xlu0 %1838 }
 0x29d   : > { %v1867_v40 = vmul.f32 %v1844_v60, %v3285_v18  ;;  %v1866_v1 = vmul.f32 %v1839_v63, %v3280_v58  ;;  %v1927_v38 = vadd.f32 %v1926_v59, %v1910_v29 }
 0x29f   : > { %v1884_v4 = vadd.f32 %v1883_v3, %v1866_v1  ;;  %v1911_v45 = vmul.f32 %v1866_v1, %v3280_v58  ;;  %v1912_v6 = vmul.f32 %v1867_v40, %v3285_v18 }
 0x2a1   : > { %v1885_v10 = vadd.f32 %v1884_v4, %v1867_v40  ;;  %v1928_v51 = vadd.f32 %v1927_v38, %v1911_v45 }
 0x2a3   : > { %v1886_v30 = vadd.f32 %v1885_v10, %v1868_v2  ;;  %v1929_v24 = vadd.f32 %v1928_v51, %v1912_v6 }
 0x2a5   : > { %v1887_v11 = vrot.slane %v1886_v30, 4  ;;  %v1930_v54 = vadd.f32 %v1929_v24, %v1913_v52 }
 0x2a7   : > { %v1888_v37 = vadd.f32 %v1887_v11, %v1886_v30  ;;  %v1931_v36 = vrot.slane %v1930_v54, 4 }
 0x2a9   : > { %v1889_v5 = vrot.slane %v1888_v37, 2  ;;  %v1932_v58 = vadd.f32 %v1931_v36, %v1930_v54 }
 0x2ab   : > { %v1933_v16 = vrot.slane %v1932_v58, 2  ;;  %v1890_v21 = vadd.f32 %v1889_v5, %v1888_v37 }
 0x2ad   : > { %v1891_v18 = vrot.slane %v1890_v21, 1  ;;  %v1934_v17 = vadd.f32 %v1933_v16, %v1932_v58 }
 0x2af   : > { %v1892_v9 = vadd.f32 %v1891_v18, %v1890_v21  ;;  %v1935_v61 = vrot.slane %v1934_v17, 1 }
 0x2b1   : > { %v1893_v31 = vadd.f32 %v1892_v9, %v1869_v25  ;;  %v1936_v15 = vadd.f32 %v1935_v61, %v1934_v17 }
 0x2b3   : > { %1894 = vst [vmem:[%s3296_s26] sm:$0x1] %v1893_v31  ;;  %v1937_v46 = vadd.f32 %v1936_v15, %v1895_v13 }
 0x2b4   : > { %2497 = shalt.err (!%p2494_p10)
}
 0x2b5   : > { %2331 = dma.vmem_to_hbm [thread:$0]  (%p2760_p12), %s1979_s18, 16, %s1981_s24, %s1945_s25   ;;  %1938 = vst [vmem:[%s3300_s29] sm:$0x1] %v1937_v46 }
 0x2b6   : > { %s2512_s26 = sshra.s32 %s1994_s8, 4  ;;  %s2518_s23 = scalar_lea.hbm %s3475_s5, 2  ;;  %s2513_s26 = int_to_ptr.hbm [resolvable:$true] %s2512_s26 }
 0x2b7   : > { %s2514_s16 = scalar_lea.hbm %s2513_s26, 1  ;;  %p2519_p4 = scmp.lt.s32.totalorder %s2513_s26, %s3475_s5 }
 0x2b8   : > { %p2515_p11 = scmp.ne.s32.totalorder %s2513_s26, %s2514_s16  ;;  %p2520_p3 = scmp.lt.s32.totalorder %s2518_s23, %s2514_s16 }
 0x2ba   : > { %p2516_p0 = pnand %p2515_p11, %p2760_p12  ;;  %p2521_p2 = por %p2520_p3, %p2519_p4 }
 0x2bc   : > { %p2517_p1 = pneg %p2516_p0 }
 0x2be   : > { %p2522_p5 = pnand %p2521_p2, %p2517_p1 }
 0x2c0   : > { %2525 = shalt.err (!%p2522_p5)
}
 0x2c1   : > { %2332 = dma.vmem_to_hbm [thread:$0]  (%p2760_p12), %s3399_s15, 16, %s1994_s8, %s1945_s25  }
 0x2c2 PF: > { %p2346_p6 = scmp.ge.s32.totalorder %s2620_s28, 2  ;;  %s2005_s29 = sand.u32 1, %s2592_s21  }
 0x2c3   : > { %s2006_s18 = scalar_lea.sflag [#allocation3], %s2005_s29 }
 0x2c4   : > { %p2337_p8 = pnand %p2346_p6, %p2748_p7 }
 0x2c6   : > { %p2338_p9 = pneg %p2337_p8 }
 0x2c8   : > { %2571 = dma.done.wait (%p2338_p9), %s2006_s18, 2304  }
 0x2c9   : > { %2573 = vsyncadd (%p2338_p9), %s2006_s18, 4294964992  ;;  %s3506_s24 = sadd.s32 4294967294, %s2620_s28   ;;  %p2340_p10 = pnand %p2346_p6, %p2772_p13 }
 0x2ca   : > { %s2015_s17 = sand.u32 1, %s3506_s24  }
 0x2cb   : > { %p2341_p11 = pneg %p2340_p10  ;;  %s2016_s15 = scalar_lea.sflag [#allocation5], %s2015_s17 }
 0x2cd   : > { %2575 = dma.done.wait (%p2341_p11), %s2016_s15, 32  }
 0x2ce   : > { %2577 = vsyncadd (%p2341_p11), %s2016_s15, 4294967264  ;;  %s22_s28 = sadd.s32 1, %s2620_s28   ;;  %s3507_s14 = sld [smem:[#allocation9_spill]] }
 0x2cf   : > { %p19_p12 = scmp.ge.s32.totalorder %s22_s28, 6   ;;  %s3508_s23 = sld [smem:[#allocation14_spill]] }
 0x2d0   : > { %s3509_s24 = sld [smem:[#allocation10_spill]]  ;;  %s3513_s18 = smov %s2584_s19 }
 0x2d1   : > { %s3510_s25 = sld [smem:[#allocation11_spill]]  ;;  %s3514_s19 = smov %s2588_s20 }
 0x2d2   : > { %s3511_s26 = sld [smem:[#allocation12_spill]]  ;;  %s3515_s20 = smov %s2765_s30 }
 0x2d3   : > { %s3512_s27 = sld [smem:[#allocation13_spill]]  ;;  %s3516_s21 = smov %s2596_s22 }
 0x2d4   : > { %s3517_s22 = smov %s3507_s14  ;;  %21 = sbr.rel (!%p19_p12) target bundleno = 13 (0xd), region = 114 }
 0x2d9   :  { %2030 = vsyncpa [#allocation3], 1 }
 0x2da   :  { %2032 = vsyncpa [#allocation3 + $0x1], 1 }
 0x2db   :  { %2033 = vsyncpa [#allocation5], 1 }
 0x2dc   :  { %2035 = vsyncpa [#allocation5 + $0x1], 1 }

</bundles_post_ra>
